<compile_context>
chip_gen: v7x
topology: tpu7x:2x2x1
jax: 0.10.0
libtpu: 0.0.40
codegen_flags: <defaults>
</compile_context>

<pallas_src>
import jax
import jax.numpy as jnp
from jax.experimental import pallas as pl
from jax.experimental.pallas import tpu as pltpu


_LANE_CANDIDATES = (1024, 512, 256, 128)
_MIN_KERNEL_ELEMENTS = 64 * 1024  # below this, XLA fusion beats a standalone kernel


def _chip_defaults():
    """Per-generation (tile bytes, scoped-VMEM limit).

    v7x  (64 MiB VMEM, ~3.2 TB/s HBM): 4 MiB tiles keep the ~0.35 us per-step
         pipeline overhead under ~10% of the tile DMA time; 40 MiB scoped
         limit covers 2 in + 2 out double-buffers with headroom.
    v5e/v6e (128 MiB VMEM): 2 MiB tiles already sit at >85% of the HBM
         roofline; 32 MiB scoped limit (above v5e's 16 MiB default).
    """
    block_bytes = 2 * 1024 * 1024
    vmem_limit = 32 * 1024 * 1024
    try:
        info = pltpu.get_tpu_info()
        vmem_cap = getattr(info, "vmem_capacity_bytes", None)
        if vmem_cap is not None and vmem_cap <= 64 * 1024 * 1024:
            block_bytes = 4 * 1024 * 1024
            vmem_limit = 40 * 1024 * 1024
    except Exception:  # non-TPU / query unavailable -> conservative defaults
        pass
    return block_bytes, vmem_limit


def _make_lambda_kernel(func):
    """Kernel body: apply `func` elementwise to the current VMEM tile."""
    def kernel(x_ref, o_ref):
        o_ref[...] = func(x_ref[...]).astype(o_ref.dtype)
    return kernel


def pallas_lambda(func, x, *, min_kernel_elements=_MIN_KERNEL_ELEMENTS):
    """Pallas equivalent of Lambda(func)(x).

    CONTRACT: `func` must be either
      (a) purely elementwise (activations, scaling, ...), executed tiled in a
          Pallas kernel, or
      (b) a pure layout change (reshape/view), applied in plain JAX.
    Shape-preserving but NON-elementwise funcs (softmax over an axis,
    layernorm, cumsum, ...) would be silently computed per-tile and give
    WRONG results — do not pass them.
    # TODO(synk): no automatic guard for shape-preserving non-elementwise
    # funcs; callers must respect the contract above.
    """
    out_aval = jax.eval_shape(func, jax.ShapeDtypeStruct(x.shape, x.dtype))
    if out_aval.shape != x.shape:
        # Layout-only func (e.g. x.view(-1, 1, 28, 28)) -> no kernel needed.
        return func(x)

    total = x.size
    if total == 0 or total < min_kernel_elements:
        # Tiny tensors (the Nist.py use case): let XLA fuse the elementwise op
        # into its neighbors instead of paying kernel launch + HBM round trip.
        return func(x)

    out_dtype = out_aval.dtype
    in_itemsize = jnp.dtype(x.dtype).itemsize
    out_itemsize = jnp.dtype(out_dtype).itemsize
    max_itemsize = max(in_itemsize, out_itemsize)

    # Lane-dense last dim: largest multiple of 128 that divides the element
    # count -> zero-copy (no pad, no output slice) for common NN shapes.
    lane = None
    for cand in _LANE_CANDIDATES:
        if total % cand == 0:
            lane = cand
            break
    if lane is None:
        lane = 128  # fallback: pad the flat tail by < 128 elements

    rows = pl.cdiv(total, lane)
    padded_total = rows * lane

    # dtype-aware sublane packing (f32: 8, bf16: 16, int8/fp8: 32 rows/vreg).
    sublane_pack = max(8, 32 // min(in_itemsize, out_itemsize))

    target_block_bytes, vmem_limit_bytes = _chip_defaults()
    block_rows = max(
        sublane_pack,
        (target_block_bytes // (lane * max_itemsize))
        // sublane_pack * sublane_pack,
    )
    if rows <= block_rows:
        block_rows = rows             # single block == full array extent
        num_blocks = 1
    else:
        num_blocks = pl.cdiv(rows, block_rows)  # ragged last block is masked

    x_flat = x.reshape(-1)
    if padded_total != total:
        pad_val = 1 if jnp.issubdtype(x.dtype, jnp.inexact) else 0
        x_flat = jnp.pad(x_flat, (0, padded_total - total),
                         constant_values=pad_val)
    x2 = x_flat.reshape(rows, lane)

    # Advisory cost estimate (the kernel is HBM/EUP-bound, not FLOP-bound).
    try:
        cost = pl.estimate_cost(func, x)
    except Exception:  # pragma: no cover - fallback if tracing func fails
        cost = pl.CostEstimate(
            flops=total,
            transcendentals=total,
            bytes_accessed=total * (in_itemsize + out_itemsize),
        )

    out2 = pl.pallas_call(
        _make_lambda_kernel(func),
        out_shape=jax.ShapeDtypeStruct((rows, lane), out_dtype),
        grid_spec=pltpu.PrefetchScalarGridSpec(
            num_scalar_prefetch=0,
            grid=(num_blocks,),
            in_specs=[pl.BlockSpec((block_rows, lane), lambda i: (i, 0))],
            out_specs=pl.BlockSpec((block_rows, lane), lambda i: (i, 0)),
        ),
        compiler_params=pltpu.CompilerParams(
            dimension_semantics=("parallel",),
            vmem_limit_bytes=vmem_limit_bytes,
        ),
        cost_estimate=cost,
    )(x2)

    out_flat = out2.reshape(-1)
    if padded_total != total:
        out_flat = out_flat[:total]
    return out_flat.reshape(x.shape)


class LambdaPallas:
    """Mirror of the PyTorch Lambda module (no parameters)."""

    def __init__(self, func):
        self.func = func

    def __call__(self, x):
        return pallas_lambda(self.func, x)


if __name__ == "__main__":
    key = jax.random.PRNGKey(0)
    k0, k1, k2, k3 = jax.random.split(key, 4)

    # 1) Kernel path, zero-copy lane-dense layout, multi-block parallel grid.
    xa = jax.random.normal(k0, (2048, 1024), dtype=jnp.float32)
    out_a = jax.block_until_ready(LambdaPallas(jnp.tanh)(xa))
    ref_a = jnp.tanh(xa)
    assert out_a.shape == xa.shape and out_a.dtype == ref_a.dtype
    assert jnp.allclose(out_a, ref_a, atol=1e-5, rtol=1e-5)

    # 2) Kernel path, ragged element count (not a multiple of 128) -> the
    #    minimal pad-to-lane fallback (< 128 padded elements).
    xb = jax.random.normal(k1, (261, 257), dtype=jnp.float32)
    out_b = jax.block_until_ready(LambdaPallas(lambda v: jnp.exp(-v * v))(xb))
    ref_b = jnp.exp(-xb * xb)
    assert out_b.shape == xb.shape
    assert jnp.allclose(out_b, ref_b, atol=1e-5, rtol=1e-5)

    # 3) Small MNIST-scale input (the Nist.py use case): fast path, plain JAX.
    xc = jax.random.normal(k2, (2, 4, 16, 16), dtype=jnp.float32)
    out_c = jax.block_until_ready(LambdaPallas(jax.nn.relu)(xc))
    assert out_c.shape == xc.shape
    assert jnp.allclose(out_c, jax.nn.relu(xc))

    # 4) Shape-changing func (mirrors Nist.py's `x.view(-1, 1, 28, 28)`):
    #    pure layout glue, applied in plain JAX by the wrapper.
    xd = jax.random.normal(k3, (2, 256), dtype=jnp.float32)
    out_d = LambdaPallas(lambda v: v.reshape(-1, 1, 16, 16))(xd)
    assert out_d.shape == (2, 1, 16, 16)
    assert jnp.allclose(out_d, xd.reshape(-1, 1, 16, 16))

    print("KERNEL_OK")
</pallas_src>

<mosaic_0001>
module attributes {stable_mosaic.version = 11 : i64} {
  func.func @kernel(%arg0: i32, %arg1: memref<512x1024xf32, #tpu.memory_space<vmem>>, %arg2: memref<512x1024xf32, #tpu.memory_space<vmem>>) attributes {dimension_semantics = [#tpu.dimension_semantics<parallel>], iteration_bounds = array<i64: 4>, scalar_prefetch = 0 : i64, scratch_operands = 0 : i64, tpu.core_type = #tpu.core_type<tc>, window_params = [{transform_indices = @transform_0, window_bounds = array<i64: 512, 1024>}, {transform_indices = @transform_1, window_bounds = array<i64: 512, 1024>}]} {
    %c0 = arith.constant 0 : index
    %c0_0 = arith.constant 0 : index
    %0 = vector.load %arg1[%c0, %c0_0] : memref<512x1024xf32, #tpu.memory_space<vmem>>, vector<512x1024xf32>
    %1 = math.tanh %0 : vector<512x1024xf32>
    %c0_1 = arith.constant 0 : index
    %c0_2 = arith.constant 0 : index
    %2 = vector.load %arg2[%c0_1, %c0_2] : memref<512x1024xf32, #tpu.memory_space<vmem>>, vector<512x1024xf32>
    tpu.vector_store %arg2[%c0_1, %c0_2], %1 {strides = array<i32>} : memref<512x1024xf32, #tpu.memory_space<vmem>>, vector<512x1024xf32>,
    return
  }
  func.func @transform_0(%arg0: i32) -> (i32, i32) {
    %c0_i32 = arith.constant 0 : i32
    %c0_i32_0 = arith.constant 0 : i32
    return %arg0, %c0_i32 : i32, i32
  }
  func.func @transform_1(%arg0: i32) -> (i32, i32) {
    %c0_i32 = arith.constant 0 : i32
    %c0_i32_0 = arith.constant 0 : i32
    return %arg0, %c0_i32 : i32, i32
  }
}

</mosaic_0001>

<bundles_post_ra>
// kernel: tpu_custom_call.1
= control target key start
LH: loop header
LB: loop body
LE: loop exit
PB: predicated region body
PF: predicated region fallthrough
CT: control target
= control target key end

     0   :  { %6 = vsyncpa [#allocation3], 0  ;;  %s4163_s0 = inlined_call_operand.hbm [shape: f32[2048,1024], index: 0, kind: input, shape index: {}]   ;;  %s4164_s1 = inlined_call_operand.hbm [shape: f32[2048,1024], index: 1, kind: output, shape index: {}]  }
   0x1   :  { %8 = vsyncpa [#allocation3 + $0x1], 0 }
   0x2   :  { %9 = vsyncpa [#allocation4], 0 }
   0x3   :  { %11 = vsyncpa [#allocation4 + $0x1], 0  ;;  %s2970_s6 = smov 0   ;;  %s2972_s7 = smov 0  }
   0x4   :  { %s2974_s8 = smov 0   ;;  %s2976_s9 = smov 0  }
   0x5 LB: > { %s2991_s10 = sadd.s32 4294967295, %s2952_s9   ;;  %s1762_s11 = sadd.s32 4294967294, %s2952_s9   ;;  %s2952_s9 = sphi %s2976_s9, %s4176_s9   ;;  %s2948_s8 = sphi %s2974_s8, %s4175_s8   ;;  %s2944_s7 = sphi %s2972_s7, %s4174_s7   ;;  %s2940_s6 = sphi %s2970_s6, %s4173_s6  }
   0x6   : > { %s2995_s12 = sadd.s32 1, %s2952_s9   ;;  %s24_s13 = sadd.s32 1, %s2948_s8 }
   0x7   : > { %s21_s14 = ssub.s32 %s2952_s9, %s2995_s12  ;;  %p31_p0 = scmp.ne.s32.totalorder %s2948_s8, %s2944_s7 }
   0x8   : > { %p22_p1 = scmp.eq.s32.totalorder %s21_s14, 0  ;;  %p32_p2 = scmp.eq.s32.totalorder %s2952_s9, 0 }
   0x9   : > { %p37_p3 = scmp.ne.s32.totalorder %s2944_s7, %s2940_s6  ;;  %p38_p4 = scmp.eq.s32.totalorder %s2991_s10, 0 }
   0xa   : > { %s3007_s15 = scalar_select %p22_p1, %s2948_s8, %s24_s13  }
   0xb   : > { %p3009_p5 = por %p32_p2, %p31_p0  ;;  %p3013_p6 = por %p38_p4, %p37_p3 }
   0xc   : > { %p61_p7 = scmp.eq.s32.totalorder %s2991_s10, 3  ;;  %p67_p8 = scmp.eq.s32.totalorder %s1762_s11, 3 }
   0xd   : > { %p1794_p9 = scmp.lt.s32.totalorder %s2952_s9, 4  ;;  %s87_s20 = sand.u32 1, %s2948_s8  }
   0xe   : > { %p3019_p10 = por %p61_p7, %p31_p0  ;;  %p3023_p11 = por %p67_p8, %p37_p3 }
   0xf   : > { %s1779_s21 = sshll.u32 %s2952_s9, 16  ;;  %s1765_s22 = sshll.u32 %s87_s20, 12 }
  0x10   : > { %s4168_s18 = scalar_select %p3019_p10, 1, 0 }
  0x11   : > { %s4169_s19 = scalar_select %p3023_p11, 1, 0 }
  0x12   : > { %s3032_s25 = scalar_lea.hbm %s4163_s0, %s1779_s21  ;;  %s91_s26 = scalar_lea.vmem [#allocation2], %s1765_s22 }
  0x13   : > { %s99_s27 = sshll.u32 %s91_s26, 4  ;;  %p3036_p12 = pnand %p1794_p9, %p3009_p5  ;;  %s3040_s27 = int_to_ptr.vmem [resolvable:$true] %s99_s27 }
  0x14   : > { %s3042_s29 = scalar_lea.sflag [#allocation3], %s87_s20  ;;  %s2856_s30 = scalar_lea.hbm %s3032_s25, 65536 }
  0x15   : > { %p2857_p13 = scmp.ne.s32.totalorder %s3032_s25, %s2856_s30  ;;  %p2858_p0 = pneg %p3036_p12 }
  0x16   : > { %s2861_s4 = scalar_lea.hbm %s4163_s0, 262144  ;;  %p2862_p3 = scmp.lt.u32.totalorder %s3032_s25, %s4163_s0 }
  0x17   : > { %p2859_p1 = pnand %p2858_p0, %p2857_p13  ;;  %p2863_p4 = scmp.lt.u32.totalorder %s2861_s4, %s2856_s30 }
  0x18   : > { %p2865_p7 = scmp.lt.u32.totalorder %s2856_s30, %s3032_s25 }
  0x19   : > { %p2860_p2 = pneg %p2859_p1  ;;  %p2864_p5 = por %p2863_p4, %p2862_p3 }
  0x1b   : > { %p2866_p8 = por %p2865_p7, %p2864_p5 }
  0x1d   : > { %p2867_p9 = pnand %p2866_p8, %p2860_p2 }
  0x1f   : > { %2870 = shalt.err (!%p2867_p9)
}
  0x20   : > { %s2871_s13 = scalar_lea.vmem %s3040_s27, 65536  ;;  %s2954_s14 = smov [#allocation2]  }
  0x21   : > { %p2872_p13 = scmp.ne.s32.totalorder %s3040_s27, %s2871_s13  ;;  %s2876_s16 = sshll.u32 %s2954_s14, 4  ;;  %s2877_s16 = int_to_ptr.vmem [resolvable:$false] %s2876_s16 }
  0x22   : > { %s2878_s20 = scalar_lea.vmem %s2877_s16, 131072  ;;  %p2879_p10 = scmp.lt.s32.totalorder %s3040_s27, %s2877_s16 }
  0x23   : > { %p2874_p1 = pnand %p2872_p13, %p2858_p0  ;;  %p2880_p3 = scmp.lt.s32.totalorder %s2878_s20, %s2871_s13 }
  0x25   : > { %p2875_p11 = pneg %p2874_p1  ;;  %p2881_p4 = por %p2880_p3, %p2879_p10 }
  0x27   : > { %p2882_p5 = pnand %p2881_p4, %p2875_p11 }
  0x29   : > { %2885 = shalt.err (!%p2882_p5)
}
  0x2a   : > { %s2955_s21 = smov 1024   ;;  %s2956_s22 = smov 64  }
  0x2b   : > { %1789 = dma.hbm_to_vmem [thread:$0]  (!%p3036_p12), %s3032_s25, 65536, %s3040_s27, %s3042_s29, %s2955_s21, %s2955_s21, %s2956_s22  }
  0x2c   : > { %p1769_p0 = scmp.ge.s32.totalorder %s2952_s9, 1  ;;  %p107_p2 = scmp.lt.s32.totalorder %s2952_s9, 5 }
  0x2e   : > { %p108_p7 = pnand %p1769_p0, %p107_p2 }
  0x2f   : > { %s3073_s23 = sand.u32 (!%p108_p7), 1, %s2944_s7  }
  0x30   : > { %111 = sbr.rel (%p108_p7) target bundleno = 594 (0x252), region = 24  ;;  %s1770_s24 = sshll.u32 (!%p108_p7), %s3073_s23, 12 }
  0x31   : > { %s114_s26 = scalar_lea.sflag (!%p108_p7), [#allocation3], %s3073_s23  ;;  %s3079_s30 = scalar_lea.vmem (!%p108_p7), [#allocation2], %s1770_s24 }
  0x37   : > { %2931 = dma.done.wait (%p3013_p6), %s114_s26, 65536  }
  0x38   : > { %2933 = vsyncadd (%p3013_p6), %s114_s26, 4294901760  ;;  %v138_v0 = vld [vmem:[%s3079_s30] sm:$0xff]  ;;  %v139_v1 = vld [vmem:[%s3079_s30 + $0x8] sm:$0xff]  ;;  %s3101_s17 = scalar_lea.vmem [#allocation5], %s1770_s24  ;;  %s1781_s25 = sshll.u32 %s2991_s10, 16 }
  0x39   : > { %v140_v2 = vld [vmem:[%s3079_s30 + $0x10] sm:$0xff]  ;;  %1832 = vtanh.f32 %v138_v0  ;;  %v141_v3 = vld [vmem:[%s3079_s30 + $0x18] sm:$0xff]  ;;  %v142_v4 = vld [vmem:[%s3079_s30 + $0x20] sm:$0xff]  ;;  %s1689_s27 = sshll.u32 %s3101_s17, 4  ;;  %s4115_s2 = scalar_lea.hbm %s4164_s1, %s1781_s25  ;;  %s4117_s27 = int_to_ptr.vmem [resolvable:$true] %s1689_s27 }
  0x3a   : > { %1834 = vtanh.f32 %v139_v1  ;;  %v143_v5 = vld [vmem:[%s3079_s30 + $0x28] sm:$0xff]  ;;  %v144_v6 = vld [vmem:[%s3079_s30 + $0x30] sm:$0xff]  ;;  %v145_v7 = vld [vmem:[%s3079_s30 + $0x38] sm:$0xff]  ;;  %s1675_s10 = scalar_lea.sflag [#allocation4], %s3073_s23  ;;  %s2886_s3 = scalar_lea.vmem %s4117_s27, 65536 }
  0x3b   : > { %1836 = vtanh.f32 %v140_v2  ;;  %v146_v8 = vld [vmem:[%s3079_s30 + $0x40] sm:$0xff]  ;;  %v147_v9 = vld [vmem:[%s3079_s30 + $0x48] sm:$0xff]  ;;  %v148_v10 = vld [vmem:[%s3079_s30 + $0x50] sm:$0xff]  ;;  %p2887_p6 = scmp.ne.s32.totalorder %s4117_s27, %s2886_s3  ;;  %p4171_p10 = scmp.ne.s32.totalorder %s4168_s18, 0 }
  0x3c   : > { %1838 = vtanh.f32 %v141_v3  ;;  %v149_v11 = vld [vmem:[%s3079_s30 + $0x58] sm:$0xff]  ;;  %v150_v12 = vld [vmem:[%s3079_s30 + $0x60] sm:$0xff]  ;;  %v151_v14 = vld [vmem:[%s3079_s30 + $0x68] sm:$0xff]  ;;  %s2957_s4 = smov [#allocation5]  }
  0x3d   : > { %1840 = vtanh.f32 %v142_v4  ;;  %v152_v16 = vld [vmem:[%s3079_s30 + $0x70] sm:$0xff]  ;;  %v153_v18 = vld [vmem:[%s3079_s30 + $0x78] sm:$0xff]  ;;  %v154_v20 = vld [vmem:[%s3079_s30 + $0x80] sm:$0xff]  ;;  %p2888_p11 = pnand %p2887_p6, %p4171_p10  ;;  %s2890_s5 = sshll.u32 %s2957_s4, 4  ;;  %s2891_s5 = int_to_ptr.vmem [resolvable:$false] %s2890_s5 }
  0x3e   : > { %1842 = vtanh.f32 %v143_v5  ;;  %v155_v22 = vld [vmem:[%s3079_s30 + $0x88] sm:$0xff]  ;;  %v156_v24 = vld [vmem:[%s3079_s30 + $0x90] sm:$0xff]  ;;  %v157_v26 = vld [vmem:[%s3079_s30 + $0x98] sm:$0xff]  ;;  %s2892_s11 = scalar_lea.vmem %s2891_s5, 131072  ;;  %p2893_p8 = scmp.lt.s32.totalorder %s4117_s27, %s2891_s5 }
  0x3f   : > { %1844 = vtanh.f32 %v144_v6  ;;  %v158_v28 = vld [vmem:[%s3079_s30 + $0xa0] sm:$0xff]  ;;  %v159_v30 = vld [vmem:[%s3079_s30 + $0xa8] sm:$0xff]  ;;  %v160_v32 = vld [vmem:[%s3079_s30 + $0xb0] sm:$0xff]  ;;  %p2889_p12 = pneg %p2888_p11  ;;  %p2894_p9 = scmp.lt.s32.totalorder %s2892_s11, %s2886_s3 }
  0x40   : > { %1846 = vtanh.f32 %v145_v7  ;;  %v161_v34 = vld [vmem:[%s3079_s30 + $0xb8] sm:$0xff]  ;;  %v162_v36 = vld [vmem:[%s3079_s30 + $0xc0] sm:$0xff]  ;;  %v163_v38 = vld [vmem:[%s3079_s30 + $0xc8] sm:$0xff] }
  0x41   : > { %1848 = vtanh.f32 %v146_v8  ;;  %v164_v40 = vld [vmem:[%s3079_s30 + $0xd0] sm:$0xff]  ;;  %v165_v42 = vld [vmem:[%s3079_s30 + $0xd8] sm:$0xff]  ;;  %v166_v44 = vld [vmem:[%s3079_s30 + $0xe0] sm:$0xff]  ;;  %p2895_p13 = por %p2894_p9, %p2893_p8 }
  0x42   : > { %1850 = vtanh.f32 %v147_v9  ;;  %v167_v46 = vld [vmem:[%s3079_s30 + $0xe8] sm:$0xff]  ;;  %v168_v48 = vld [vmem:[%s3079_s30 + $0xf0] sm:$0xff]  ;;  %v169_v50 = vld [vmem:[%s3079_s30 + $0xf8] sm:$0xff] }
  0x43   : > { %v1833_v13 = vpop.eup %1832  ;;  %1852 = vtanh.f32 %v148_v10  ;;  %v170_v52 = vld [vmem:[%s3079_s30 + $0x100] sm:$0xff]  ;;  %v171_v54 = vld [vmem:[%s3079_s30 + $0x108] sm:$0xff]  ;;  %v172_v56 = vld [vmem:[%s3079_s30 + $0x110] sm:$0xff]  ;;  %p2896_p1 = pnand %p2895_p13, %p2889_p12 }
  0x44   : > { %v1835_v15 = vpop.eup %1834  ;;  %1162 = vst [vmem:[%s3101_s17] sm:$0xff] %v1833_v13  ;;  %1854 = vtanh.f32 %v149_v11  ;;  %v173_v58 = vld [vmem:[%s3079_s30 + $0x118] sm:$0xff]  ;;  %v174_v60 = vld [vmem:[%s3079_s30 + $0x120] sm:$0xff]  ;;  %v175_v62 = vld [vmem:[%s3079_s30 + $0x128] sm:$0xff] }
  0x45   : > { %v1837_v17 = vpop.eup %1836  ;;  %1163 = vst [vmem:[%s3101_s17 + $0x8] sm:$0xff] %v1835_v15  ;;  %1856 = vtanh.f32 %v150_v12  ;;  %v176_v0 = vld [vmem:[%s3079_s30 + $0x130] sm:$0xff]  ;;  %v177_v2 = vld [vmem:[%s3079_s30 + $0x138] sm:$0xff]  ;;  %v178_v4 = vld [vmem:[%s3079_s30 + $0x140] sm:$0xff] }
  0x46   : > { %v1839_v19 = vpop.eup %1838  ;;  %1164 = vst [vmem:[%s3101_s17 + $0x10] sm:$0xff] %v1837_v17  ;;  %1858 = vtanh.f32 %v151_v14  ;;  %v179_v6 = vld [vmem:[%s3079_s30 + $0x148] sm:$0xff]  ;;  %v180_v8 = vld [vmem:[%s3079_s30 + $0x150] sm:$0xff]  ;;  %v181_v10 = vld [vmem:[%s3079_s30 + $0x158] sm:$0xff] }
  0x47   : > { %v1841_v21 = vpop.eup %1840  ;;  %1165 = vst [vmem:[%s3101_s17 + $0x18] sm:$0xff] %v1839_v19  ;;  %1860 = vtanh.f32 %v152_v16  ;;  %v182_v12 = vld [vmem:[%s3079_s30 + $0x160] sm:$0xff]  ;;  %v183_v14 = vld [vmem:[%s3079_s30 + $0x168] sm:$0xff]  ;;  %v184_v16 = vld [vmem:[%s3079_s30 + $0x170] sm:$0xff] }
  0x48   : > { %v1843_v23 = vpop.eup %1842  ;;  %1166 = vst [vmem:[%s3101_s17 + $0x20] sm:$0xff] %v1841_v21  ;;  %1862 = vtanh.f32 %v153_v18  ;;  %v185_v18 = vld [vmem:[%s3079_s30 + $0x178] sm:$0xff] }
  0x49   : > { %v1845_v25 = vpop.eup %1844  ;;  %1167 = vst [vmem:[%s3101_s17 + $0x28] sm:$0xff] %v1843_v23  ;;  %1864 = vtanh.f32 %v154_v20  ;;  %v186_v20 = vld [vmem:[%s3079_s30 + $0x180] sm:$0xff] }
  0x4a   : > { %v1847_v27 = vpop.eup %1846  ;;  %1168 = vst [vmem:[%s3101_s17 + $0x30] sm:$0xff] %v1845_v25  ;;  %1866 = vtanh.f32 %v155_v22  ;;  %v187_v22 = vld [vmem:[%s3079_s30 + $0x188] sm:$0xff] }
  0x4b   : > { %v1849_v29 = vpop.eup %1848  ;;  %1169 = vst [vmem:[%s3101_s17 + $0x38] sm:$0xff] %v1847_v27  ;;  %1868 = vtanh.f32 %v156_v24  ;;  %v188_v24 = vld [vmem:[%s3079_s30 + $0x190] sm:$0xff] }
  0x4c   : > { %v1851_v31 = vpop.eup %1850  ;;  %1170 = vst [vmem:[%s3101_s17 + $0x40] sm:$0xff] %v1849_v29  ;;  %1870 = vtanh.f32 %v157_v26  ;;  %v189_v26 = vld [vmem:[%s3079_s30 + $0x198] sm:$0xff] }
  0x4d   : > { %v1853_v33 = vpop.eup %1852  ;;  %1171 = vst [vmem:[%s3101_s17 + $0x48] sm:$0xff] %v1851_v31  ;;  %1872 = vtanh.f32 %v158_v28  ;;  %v190_v28 = vld [vmem:[%s3079_s30 + $0x1a0] sm:$0xff] }
  0x4e   : > { %v1855_v35 = vpop.eup %1854  ;;  %1172 = vst [vmem:[%s3101_s17 + $0x50] sm:$0xff] %v1853_v33  ;;  %1874 = vtanh.f32 %v159_v30  ;;  %v191_v30 = vld [vmem:[%s3079_s30 + $0x1a8] sm:$0xff] }
  0x4f   : > { %v1857_v37 = vpop.eup %1856  ;;  %1173 = vst [vmem:[%s3101_s17 + $0x58] sm:$0xff] %v1855_v35  ;;  %1876 = vtanh.f32 %v160_v32  ;;  %v192_v32 = vld [vmem:[%s3079_s30 + $0x1b0] sm:$0xff] }
  0x50   : > { %v1859_v39 = vpop.eup %1858  ;;  %1174 = vst [vmem:[%s3101_s17 + $0x60] sm:$0xff] %v1857_v37  ;;  %1878 = vtanh.f32 %v161_v34  ;;  %v193_v34 = vld [vmem:[%s3079_s30 + $0x1b8] sm:$0xff] }
  0x51   : > { %v1861_v41 = vpop.eup %1860  ;;  %1175 = vst [vmem:[%s3101_s17 + $0x68] sm:$0xff] %v1859_v39  ;;  %1880 = vtanh.f32 %v162_v36  ;;  %v194_v36 = vld [vmem:[%s3079_s30 + $0x1c0] sm:$0xff] }
  0x52   : > { %v1863_v43 = vpop.eup %1862  ;;  %1176 = vst [vmem:[%s3101_s17 + $0x70] sm:$0xff] %v1861_v41  ;;  %1882 = vtanh.f32 %v163_v38  ;;  %v195_v38 = vld [vmem:[%s3079_s30 + $0x1c8] sm:$0xff] }
  0x53   : > { %v1865_v45 = vpop.eup %1864  ;;  %1177 = vst [vmem:[%s3101_s17 + $0x78] sm:$0xff] %v1863_v43  ;;  %1884 = vtanh.f32 %v164_v40  ;;  %v196_v40 = vld [vmem:[%s3079_s30 + $0x1d0] sm:$0xff] }
  0x54   : > { %v1867_v47 = vpop.eup %1866  ;;  %1178 = vst [vmem:[%s3101_s17 + $0x80] sm:$0xff] %v1865_v45  ;;  %1886 = vtanh.f32 %v165_v42  ;;  %v197_v42 = vld [vmem:[%s3079_s30 + $0x1d8] sm:$0xff] }
  0x55   : > { %v1869_v49 = vpop.eup %1868  ;;  %1179 = vst [vmem:[%s3101_s17 + $0x88] sm:$0xff] %v1867_v47  ;;  %1888 = vtanh.f32 %v166_v44  ;;  %v198_v44 = vld [vmem:[%s3079_s30 + $0x1e0] sm:$0xff] }
  0x56   : > { %v1871_v51 = vpop.eup %1870  ;;  %1180 = vst [vmem:[%s3101_s17 + $0x90] sm:$0xff] %v1869_v49  ;;  %1890 = vtanh.f32 %v167_v46  ;;  %v199_v46 = vld [vmem:[%s3079_s30 + $0x1e8] sm:$0xff] }
  0x57   : > { %v1873_v53 = vpop.eup %1872  ;;  %1181 = vst [vmem:[%s3101_s17 + $0x98] sm:$0xff] %v1871_v51  ;;  %1892 = vtanh.f32 %v168_v48  ;;  %v200_v48 = vld [vmem:[%s3079_s30 + $0x1f0] sm:$0xff] }
  0x58   : > { %v1875_v55 = vpop.eup %1874  ;;  %1182 = vst [vmem:[%s3101_s17 + $0xa0] sm:$0xff] %v1873_v53  ;;  %1894 = vtanh.f32 %v169_v50  ;;  %v201_v50 = vld [vmem:[%s3079_s30 + $0x1f8] sm:$0xff] }
  0x59   : > { %v1877_v57 = vpop.eup %1876  ;;  %1183 = vst [vmem:[%s3101_s17 + $0xa8] sm:$0xff] %v1875_v55  ;;  %1896 = vtanh.f32 %v170_v52  ;;  %v202_v52 = vld [vmem:[%s3079_s30 + $0x200] sm:$0xff] }
  0x5a   : > { %v1879_v59 = vpop.eup %1878  ;;  %1184 = vst [vmem:[%s3101_s17 + $0xb0] sm:$0xff] %v1877_v57  ;;  %1898 = vtanh.f32 %v171_v54  ;;  %v203_v54 = vld [vmem:[%s3079_s30 + $0x208] sm:$0xff] }
  0x5b   : > { %v1881_v61 = vpop.eup %1880  ;;  %1185 = vst [vmem:[%s3101_s17 + $0xb8] sm:$0xff] %v1879_v59  ;;  %1900 = vtanh.f32 %v172_v56  ;;  %v204_v56 = vld [vmem:[%s3079_s30 + $0x210] sm:$0xff] }
  0x5c   : > { %v1883_v63 = vpop.eup %1882  ;;  %1186 = vst [vmem:[%s3101_s17 + $0xc0] sm:$0xff] %v1881_v61  ;;  %1902 = vtanh.f32 %v173_v58  ;;  %v205_v58 = vld [vmem:[%s3079_s30 + $0x218] sm:$0xff] }
  0x5d   : > { %v1885_v1 = vpop.eup %1884  ;;  %1187 = vst [vmem:[%s3101_s17 + $0xc8] sm:$0xff] %v1883_v63  ;;  %1904 = vtanh.f32 %v174_v60  ;;  %v206_v60 = vld [vmem:[%s3079_s30 + $0x220] sm:$0xff] }
  0x5e   : > { %v1887_v3 = vpop.eup %1886  ;;  %1188 = vst [vmem:[%s3101_s17 + $0xd0] sm:$0xff] %v1885_v1  ;;  %1906 = vtanh.f32 %v175_v62  ;;  %v207_v62 = vld [vmem:[%s3079_s30 + $0x228] sm:$0xff] }
  0x5f   : > { %v1889_v5 = vpop.eup %1888  ;;  %1189 = vst [vmem:[%s3101_s17 + $0xd8] sm:$0xff] %v1887_v3  ;;  %1908 = vtanh.f32 %v176_v0  ;;  %v208_v0 = vld [vmem:[%s3079_s30 + $0x230] sm:$0xff] }
  0x60   : > { %v1891_v7 = vpop.eup %1890  ;;  %1190 = vst [vmem:[%s3101_s17 + $0xe0] sm:$0xff] %v1889_v5  ;;  %1910 = vtanh.f32 %v177_v2  ;;  %v209_v2 = vld [vmem:[%s3079_s30 + $0x238] sm:$0xff] }
  0x61   : > { %v1893_v9 = vpop.eup %1892  ;;  %1191 = vst [vmem:[%s3101_s17 + $0xe8] sm:$0xff] %v1891_v7  ;;  %1912 = vtanh.f32 %v178_v4  ;;  %v210_v4 = vld [vmem:[%s3079_s30 + $0x240] sm:$0xff] }
  0x62   : > { %v1895_v11 = vpop.eup %1894  ;;  %1192 = vst [vmem:[%s3101_s17 + $0xf0] sm:$0xff] %v1893_v9  ;;  %1914 = vtanh.f32 %v179_v6  ;;  %v211_v6 = vld [vmem:[%s3079_s30 + $0x248] sm:$0xff] }
  0x63   : > { %v1897_v13 = vpop.eup %1896  ;;  %1193 = vst [vmem:[%s3101_s17 + $0xf8] sm:$0xff] %v1895_v11  ;;  %1916 = vtanh.f32 %v180_v8  ;;  %v212_v8 = vld [vmem:[%s3079_s30 + $0x250] sm:$0xff] }
  0x64   : > { %v1899_v15 = vpop.eup %1898  ;;  %1194 = vst [vmem:[%s3101_s17 + $0x100] sm:$0xff] %v1897_v13  ;;  %1918 = vtanh.f32 %v181_v10  ;;  %v213_v10 = vld [vmem:[%s3079_s30 + $0x258] sm:$0xff] }
  0x65   : > { %v1901_v17 = vpop.eup %1900  ;;  %1195 = vst [vmem:[%s3101_s17 + $0x108] sm:$0xff] %v1899_v15  ;;  %1920 = vtanh.f32 %v182_v12  ;;  %v214_v12 = vld [vmem:[%s3079_s30 + $0x260] sm:$0xff] }
  0x66   : > { %v1903_v19 = vpop.eup %1902  ;;  %1196 = vst [vmem:[%s3101_s17 + $0x110] sm:$0xff] %v1901_v17  ;;  %1922 = vtanh.f32 %v183_v14  ;;  %v215_v14 = vld [vmem:[%s3079_s30 + $0x268] sm:$0xff] }
  0x67   : > { %v1905_v21 = vpop.eup %1904  ;;  %1197 = vst [vmem:[%s3101_s17 + $0x118] sm:$0xff] %v1903_v19  ;;  %1924 = vtanh.f32 %v184_v16  ;;  %v216_v16 = vld [vmem:[%s3079_s30 + $0x270] sm:$0xff] }
  0x68   : > { %v1907_v23 = vpop.eup %1906  ;;  %1198 = vst [vmem:[%s3101_s17 + $0x120] sm:$0xff] %v1905_v21  ;;  %1926 = vtanh.f32 %v185_v18  ;;  %v217_v18 = vld [vmem:[%s3079_s30 + $0x278] sm:$0xff] }
  0x69   : > { %v1909_v25 = vpop.eup %1908  ;;  %1199 = vst [vmem:[%s3101_s17 + $0x128] sm:$0xff] %v1907_v23  ;;  %1928 = vtanh.f32 %v186_v20  ;;  %v218_v20 = vld [vmem:[%s3079_s30 + $0x280] sm:$0xff] }
  0x6a   : > { %v1911_v27 = vpop.eup %1910  ;;  %1200 = vst [vmem:[%s3101_s17 + $0x130] sm:$0xff] %v1909_v25  ;;  %1930 = vtanh.f32 %v187_v22  ;;  %v219_v22 = vld [vmem:[%s3079_s30 + $0x288] sm:$0xff] }
  0x6b   : > { %v1913_v29 = vpop.eup %1912  ;;  %1201 = vst [vmem:[%s3101_s17 + $0x138] sm:$0xff] %v1911_v27  ;;  %1932 = vtanh.f32 %v188_v24  ;;  %v220_v24 = vld [vmem:[%s3079_s30 + $0x290] sm:$0xff] }
  0x6c   : > { %v1915_v31 = vpop.eup %1914  ;;  %1202 = vst [vmem:[%s3101_s17 + $0x140] sm:$0xff] %v1913_v29  ;;  %1934 = vtanh.f32 %v189_v26  ;;  %v221_v26 = vld [vmem:[%s3079_s30 + $0x298] sm:$0xff] }
  0x6d   : > { %v1917_v33 = vpop.eup %1916  ;;  %1203 = vst [vmem:[%s3101_s17 + $0x148] sm:$0xff] %v1915_v31  ;;  %1936 = vtanh.f32 %v190_v28  ;;  %v222_v28 = vld [vmem:[%s3079_s30 + $0x2a0] sm:$0xff] }
  0x6e   : > { %v1919_v35 = vpop.eup %1918  ;;  %1204 = vst [vmem:[%s3101_s17 + $0x150] sm:$0xff] %v1917_v33  ;;  %1938 = vtanh.f32 %v191_v30  ;;  %v223_v30 = vld [vmem:[%s3079_s30 + $0x2a8] sm:$0xff] }
  0x6f   : > { %v1921_v37 = vpop.eup %1920  ;;  %1205 = vst [vmem:[%s3101_s17 + $0x158] sm:$0xff] %v1919_v35  ;;  %1940 = vtanh.f32 %v192_v32  ;;  %v224_v32 = vld [vmem:[%s3079_s30 + $0x2b0] sm:$0xff] }
  0x70   : > { %v1923_v39 = vpop.eup %1922  ;;  %1206 = vst [vmem:[%s3101_s17 + $0x160] sm:$0xff] %v1921_v37  ;;  %1942 = vtanh.f32 %v193_v34  ;;  %v225_v34 = vld [vmem:[%s3079_s30 + $0x2b8] sm:$0xff] }
  0x71   : > { %v1925_v41 = vpop.eup %1924  ;;  %1207 = vst [vmem:[%s3101_s17 + $0x168] sm:$0xff] %v1923_v39  ;;  %1944 = vtanh.f32 %v194_v36  ;;  %v226_v36 = vld [vmem:[%s3079_s30 + $0x2c0] sm:$0xff] }
  0x72   : > { %v1927_v43 = vpop.eup %1926  ;;  %1208 = vst [vmem:[%s3101_s17 + $0x170] sm:$0xff] %v1925_v41  ;;  %1946 = vtanh.f32 %v195_v38  ;;  %v227_v38 = vld [vmem:[%s3079_s30 + $0x2c8] sm:$0xff] }
  0x73   : > { %v1929_v45 = vpop.eup %1928  ;;  %1209 = vst [vmem:[%s3101_s17 + $0x178] sm:$0xff] %v1927_v43  ;;  %1948 = vtanh.f32 %v196_v40  ;;  %v228_v40 = vld [vmem:[%s3079_s30 + $0x2d0] sm:$0xff] }
  0x74   : > { %v1931_v47 = vpop.eup %1930  ;;  %1210 = vst [vmem:[%s3101_s17 + $0x180] sm:$0xff] %v1929_v45  ;;  %1950 = vtanh.f32 %v197_v42  ;;  %v229_v42 = vld [vmem:[%s3079_s30 + $0x2d8] sm:$0xff] }
  0x75   : > { %v1933_v49 = vpop.eup %1932  ;;  %1211 = vst [vmem:[%s3101_s17 + $0x188] sm:$0xff] %v1931_v47  ;;  %1952 = vtanh.f32 %v198_v44  ;;  %v230_v44 = vld [vmem:[%s3079_s30 + $0x2e0] sm:$0xff] }
  0x76   : > { %v1935_v51 = vpop.eup %1934  ;;  %1212 = vst [vmem:[%s3101_s17 + $0x190] sm:$0xff] %v1933_v49  ;;  %1954 = vtanh.f32 %v199_v46  ;;  %v231_v46 = vld [vmem:[%s3079_s30 + $0x2e8] sm:$0xff] }
  0x77   : > { %v1937_v53 = vpop.eup %1936  ;;  %1213 = vst [vmem:[%s3101_s17 + $0x198] sm:$0xff] %v1935_v51  ;;  %1956 = vtanh.f32 %v200_v48  ;;  %v232_v48 = vld [vmem:[%s3079_s30 + $0x2f0] sm:$0xff] }
  0x78   : > { %v1939_v55 = vpop.eup %1938  ;;  %1214 = vst [vmem:[%s3101_s17 + $0x1a0] sm:$0xff] %v1937_v53  ;;  %1958 = vtanh.f32 %v201_v50  ;;  %v233_v50 = vld [vmem:[%s3079_s30 + $0x2f8] sm:$0xff] }
  0x79   : > { %v1941_v57 = vpop.eup %1940  ;;  %1215 = vst [vmem:[%s3101_s17 + $0x1a8] sm:$0xff] %v1939_v55  ;;  %1960 = vtanh.f32 %v202_v52  ;;  %v234_v52 = vld [vmem:[%s3079_s30 + $0x300] sm:$0xff] }
  0x7a   : > { %v1943_v59 = vpop.eup %1942  ;;  %1216 = vst [vmem:[%s3101_s17 + $0x1b0] sm:$0xff] %v1941_v57  ;;  %1962 = vtanh.f32 %v203_v54  ;;  %v235_v54 = vld [vmem:[%s3079_s30 + $0x308] sm:$0xff] }
  0x7b   : > { %v1945_v61 = vpop.eup %1944  ;;  %1217 = vst [vmem:[%s3101_s17 + $0x1b8] sm:$0xff] %v1943_v59  ;;  %1964 = vtanh.f32 %v204_v56  ;;  %v236_v56 = vld [vmem:[%s3079_s30 + $0x310] sm:$0xff] }
  0x7c   : > { %v1947_v63 = vpop.eup %1946  ;;  %1218 = vst [vmem:[%s3101_s17 + $0x1c0] sm:$0xff] %v1945_v61  ;;  %1966 = vtanh.f32 %v205_v58  ;;  %v237_v58 = vld [vmem:[%s3079_s30 + $0x318] sm:$0xff] }
  0x7d   : > { %v1949_v1 = vpop.eup %1948  ;;  %1219 = vst [vmem:[%s3101_s17 + $0x1c8] sm:$0xff] %v1947_v63  ;;  %1968 = vtanh.f32 %v206_v60  ;;  %v238_v60 = vld [vmem:[%s3079_s30 + $0x320] sm:$0xff] }
  0x7e   : > { %v1951_v3 = vpop.eup %1950  ;;  %1220 = vst [vmem:[%s3101_s17 + $0x1d0] sm:$0xff] %v1949_v1  ;;  %1970 = vtanh.f32 %v207_v62  ;;  %v239_v62 = vld [vmem:[%s3079_s30 + $0x328] sm:$0xff] }
  0x7f   : > { %v1953_v5 = vpop.eup %1952  ;;  %1221 = vst [vmem:[%s3101_s17 + $0x1d8] sm:$0xff] %v1951_v3  ;;  %1972 = vtanh.f32 %v208_v0  ;;  %v240_v0 = vld [vmem:[%s3079_s30 + $0x330] sm:$0xff] }
  0x80   : > { %v1955_v7 = vpop.eup %1954  ;;  %1222 = vst [vmem:[%s3101_s17 + $0x1e0] sm:$0xff] %v1953_v5  ;;  %1974 = vtanh.f32 %v209_v2  ;;  %v241_v2 = vld [vmem:[%s3079_s30 + $0x338] sm:$0xff] }
  0x81   : > { %v1957_v9 = vpop.eup %1956  ;;  %1223 = vst [vmem:[%s3101_s17 + $0x1e8] sm:$0xff] %v1955_v7  ;;  %1976 = vtanh.f32 %v210_v4  ;;  %v242_v4 = vld [vmem:[%s3079_s30 + $0x340] sm:$0xff] }
  0x82   : > { %v1959_v11 = vpop.eup %1958  ;;  %1224 = vst [vmem:[%s3101_s17 + $0x1f0] sm:$0xff] %v1957_v9  ;;  %1978 = vtanh.f32 %v211_v6  ;;  %v243_v6 = vld [vmem:[%s3079_s30 + $0x348] sm:$0xff] }
  0x83   : > { %v1961_v13 = vpop.eup %1960  ;;  %1225 = vst [vmem:[%s3101_s17 + $0x1f8] sm:$0xff] %v1959_v11  ;;  %1980 = vtanh.f32 %v212_v8  ;;  %v244_v8 = vld [vmem:[%s3079_s30 + $0x350] sm:$0xff] }
  0x84   : > { %v1963_v15 = vpop.eup %1962  ;;  %1226 = vst [vmem:[%s3101_s17 + $0x200] sm:$0xff] %v1961_v13  ;;  %1982 = vtanh.f32 %v213_v10  ;;  %v245_v10 = vld [vmem:[%s3079_s30 + $0x358] sm:$0xff] }
  0x85   : > { %v1965_v17 = vpop.eup %1964  ;;  %1227 = vst [vmem:[%s3101_s17 + $0x208] sm:$0xff] %v1963_v15  ;;  %1984 = vtanh.f32 %v214_v12  ;;  %v246_v12 = vld [vmem:[%s3079_s30 + $0x360] sm:$0xff] }
  0x86   : > { %v1967_v19 = vpop.eup %1966  ;;  %1228 = vst [vmem:[%s3101_s17 + $0x210] sm:$0xff] %v1965_v17  ;;  %1986 = vtanh.f32 %v215_v14  ;;  %v247_v14 = vld [vmem:[%s3079_s30 + $0x368] sm:$0xff] }
  0x87   : > { %v1969_v21 = vpop.eup %1968  ;;  %1229 = vst [vmem:[%s3101_s17 + $0x218] sm:$0xff] %v1967_v19  ;;  %1988 = vtanh.f32 %v216_v16  ;;  %v248_v16 = vld [vmem:[%s3079_s30 + $0x370] sm:$0xff] }
  0x88   : > { %v1971_v23 = vpop.eup %1970  ;;  %1230 = vst [vmem:[%s3101_s17 + $0x220] sm:$0xff] %v1969_v21  ;;  %1990 = vtanh.f32 %v217_v18  ;;  %v249_v18 = vld [vmem:[%s3079_s30 + $0x378] sm:$0xff] }
  0x89   : > { %v1973_v25 = vpop.eup %1972  ;;  %1231 = vst [vmem:[%s3101_s17 + $0x228] sm:$0xff] %v1971_v23  ;;  %1992 = vtanh.f32 %v218_v20  ;;  %v250_v20 = vld [vmem:[%s3079_s30 + $0x380] sm:$0xff] }
  0x8a   : > { %v1975_v27 = vpop.eup %1974  ;;  %1232 = vst [vmem:[%s3101_s17 + $0x230] sm:$0xff] %v1973_v25  ;;  %1994 = vtanh.f32 %v219_v22  ;;  %v251_v22 = vld [vmem:[%s3079_s30 + $0x388] sm:$0xff] }
  0x8b   : > { %v1977_v29 = vpop.eup %1976  ;;  %1233 = vst [vmem:[%s3101_s17 + $0x238] sm:$0xff] %v1975_v27  ;;  %1996 = vtanh.f32 %v220_v24  ;;  %v252_v24 = vld [vmem:[%s3079_s30 + $0x390] sm:$0xff] }
  0x8c   : > { %v1979_v31 = vpop.eup %1978  ;;  %1234 = vst [vmem:[%s3101_s17 + $0x240] sm:$0xff] %v1977_v29  ;;  %1998 = vtanh.f32 %v221_v26  ;;  %v253_v26 = vld [vmem:[%s3079_s30 + $0x398] sm:$0xff] }
  0x8d   : > { %v1981_v33 = vpop.eup %1980  ;;  %1235 = vst [vmem:[%s3101_s17 + $0x248] sm:$0xff] %v1979_v31  ;;  %2000 = vtanh.f32 %v222_v28  ;;  %v254_v28 = vld [vmem:[%s3079_s30 + $0x3a0] sm:$0xff] }
  0x8e   : > { %v1983_v35 = vpop.eup %1982  ;;  %1236 = vst [vmem:[%s3101_s17 + $0x250] sm:$0xff] %v1981_v33  ;;  %2002 = vtanh.f32 %v223_v30  ;;  %v255_v30 = vld [vmem:[%s3079_s30 + $0x3a8] sm:$0xff] }
  0x8f   : > { %v1985_v37 = vpop.eup %1984  ;;  %1237 = vst [vmem:[%s3101_s17 + $0x258] sm:$0xff] %v1983_v35  ;;  %2004 = vtanh.f32 %v224_v32  ;;  %v256_v32 = vld [vmem:[%s3079_s30 + $0x3b0] sm:$0xff] }
  0x90   : > { %v1987_v39 = vpop.eup %1986  ;;  %1238 = vst [vmem:[%s3101_s17 + $0x260] sm:$0xff] %v1985_v37  ;;  %2006 = vtanh.f32 %v225_v34  ;;  %v257_v34 = vld [vmem:[%s3079_s30 + $0x3b8] sm:$0xff] }
  0x91   : > { %v1989_v41 = vpop.eup %1988  ;;  %1239 = vst [vmem:[%s3101_s17 + $0x268] sm:$0xff] %v1987_v39  ;;  %2008 = vtanh.f32 %v226_v36  ;;  %v258_v36 = vld [vmem:[%s3079_s30 + $0x3c0] sm:$0xff] }
  0x92   : > { %v1991_v43 = vpop.eup %1990  ;;  %1240 = vst [vmem:[%s3101_s17 + $0x270] sm:$0xff] %v1989_v41  ;;  %2010 = vtanh.f32 %v227_v38  ;;  %v259_v38 = vld [vmem:[%s3079_s30 + $0x3c8] sm:$0xff] }
  0x93   : > { %v1993_v45 = vpop.eup %1992  ;;  %1241 = vst [vmem:[%s3101_s17 + $0x278] sm:$0xff] %v1991_v43  ;;  %2012 = vtanh.f32 %v228_v40  ;;  %v260_v40 = vld [vmem:[%s3079_s30 + $0x3d0] sm:$0xff] }
  0x94   : > { %v1995_v47 = vpop.eup %1994  ;;  %1242 = vst [vmem:[%s3101_s17 + $0x280] sm:$0xff] %v1993_v45  ;;  %2014 = vtanh.f32 %v229_v42  ;;  %v261_v42 = vld [vmem:[%s3079_s30 + $0x3d8] sm:$0xff] }
  0x95   : > { %v1997_v49 = vpop.eup %1996  ;;  %1243 = vst [vmem:[%s3101_s17 + $0x288] sm:$0xff] %v1995_v47  ;;  %2016 = vtanh.f32 %v230_v44  ;;  %v262_v44 = vld [vmem:[%s3079_s30 + $0x3e0] sm:$0xff] }
  0x96   : > { %v1999_v51 = vpop.eup %1998  ;;  %1244 = vst [vmem:[%s3101_s17 + $0x290] sm:$0xff] %v1997_v49  ;;  %2018 = vtanh.f32 %v231_v46  ;;  %v263_v46 = vld [vmem:[%s3079_s30 + $0x3e8] sm:$0xff] }
  0x97   : > { %v2001_v53 = vpop.eup %2000  ;;  %1245 = vst [vmem:[%s3101_s17 + $0x298] sm:$0xff] %v1999_v51  ;;  %2020 = vtanh.f32 %v232_v48  ;;  %v264_v48 = vld [vmem:[%s3079_s30 + $0x3f0] sm:$0xff] }
  0x98   : > { %v2003_v55 = vpop.eup %2002  ;;  %1246 = vst [vmem:[%s3101_s17 + $0x2a0] sm:$0xff] %v2001_v53  ;;  %2022 = vtanh.f32 %v233_v50  ;;  %v265_v50 = vld [vmem:[%s3079_s30 + $0x3f8] sm:$0xff] }
  0x99   : > { %v2005_v57 = vpop.eup %2004  ;;  %1247 = vst [vmem:[%s3101_s17 + $0x2a8] sm:$0xff] %v2003_v55  ;;  %2024 = vtanh.f32 %v234_v52  ;;  %v266_v52 = vld [vmem:[%s3079_s30 + $0x400] sm:$0xff] }
  0x9a   : > { %v2007_v59 = vpop.eup %2006  ;;  %1248 = vst [vmem:[%s3101_s17 + $0x2b0] sm:$0xff] %v2005_v57  ;;  %2026 = vtanh.f32 %v235_v54  ;;  %v267_v54 = vld [vmem:[%s3079_s30 + $0x408] sm:$0xff] }
  0x9b   : > { %v2009_v61 = vpop.eup %2008  ;;  %1249 = vst [vmem:[%s3101_s17 + $0x2b8] sm:$0xff] %v2007_v59  ;;  %2028 = vtanh.f32 %v236_v56  ;;  %v268_v56 = vld [vmem:[%s3079_s30 + $0x410] sm:$0xff] }
  0x9c   : > { %v2011_v63 = vpop.eup %2010  ;;  %1250 = vst [vmem:[%s3101_s17 + $0x2c0] sm:$0xff] %v2009_v61  ;;  %2030 = vtanh.f32 %v237_v58  ;;  %v269_v58 = vld [vmem:[%s3079_s30 + $0x418] sm:$0xff] }
  0x9d   : > { %v2013_v1 = vpop.eup %2012  ;;  %1251 = vst [vmem:[%s3101_s17 + $0x2c8] sm:$0xff] %v2011_v63  ;;  %2032 = vtanh.f32 %v238_v60  ;;  %v270_v60 = vld [vmem:[%s3079_s30 + $0x420] sm:$0xff] }
  0x9e   : > { %v2015_v3 = vpop.eup %2014  ;;  %1252 = vst [vmem:[%s3101_s17 + $0x2d0] sm:$0xff] %v2013_v1  ;;  %2034 = vtanh.f32 %v239_v62  ;;  %v271_v62 = vld [vmem:[%s3079_s30 + $0x428] sm:$0xff] }
  0x9f   : > { %v2017_v5 = vpop.eup %2016  ;;  %1253 = vst [vmem:[%s3101_s17 + $0x2d8] sm:$0xff] %v2015_v3  ;;  %2036 = vtanh.f32 %v240_v0  ;;  %v272_v0 = vld [vmem:[%s3079_s30 + $0x430] sm:$0xff] }
  0xa0   : > { %v2019_v7 = vpop.eup %2018  ;;  %1254 = vst [vmem:[%s3101_s17 + $0x2e0] sm:$0xff] %v2017_v5  ;;  %2038 = vtanh.f32 %v241_v2  ;;  %v273_v2 = vld [vmem:[%s3079_s30 + $0x438] sm:$0xff] }
  0xa1   : > { %v2021_v9 = vpop.eup %2020  ;;  %1255 = vst [vmem:[%s3101_s17 + $0x2e8] sm:$0xff] %v2019_v7  ;;  %2040 = vtanh.f32 %v242_v4  ;;  %v274_v4 = vld [vmem:[%s3079_s30 + $0x440] sm:$0xff] }
  0xa2   : > { %v2023_v11 = vpop.eup %2022  ;;  %1256 = vst [vmem:[%s3101_s17 + $0x2f0] sm:$0xff] %v2021_v9  ;;  %2042 = vtanh.f32 %v243_v6  ;;  %v275_v6 = vld [vmem:[%s3079_s30 + $0x448] sm:$0xff] }
  0xa3   : > { %v2025_v13 = vpop.eup %2024  ;;  %1257 = vst [vmem:[%s3101_s17 + $0x2f8] sm:$0xff] %v2023_v11  ;;  %2044 = vtanh.f32 %v244_v8  ;;  %v276_v8 = vld [vmem:[%s3079_s30 + $0x450] sm:$0xff] }
  0xa4   : > { %v2027_v15 = vpop.eup %2026  ;;  %1258 = vst [vmem:[%s3101_s17 + $0x300] sm:$0xff] %v2025_v13  ;;  %2046 = vtanh.f32 %v245_v10  ;;  %v277_v10 = vld [vmem:[%s3079_s30 + $0x458] sm:$0xff] }
  0xa5   : > { %v2029_v17 = vpop.eup %2028  ;;  %1259 = vst [vmem:[%s3101_s17 + $0x308] sm:$0xff] %v2027_v15  ;;  %2048 = vtanh.f32 %v246_v12  ;;  %v278_v12 = vld [vmem:[%s3079_s30 + $0x460] sm:$0xff] }
  0xa6   : > { %v2031_v19 = vpop.eup %2030  ;;  %1260 = vst [vmem:[%s3101_s17 + $0x310] sm:$0xff] %v2029_v17  ;;  %2050 = vtanh.f32 %v247_v14  ;;  %v279_v14 = vld [vmem:[%s3079_s30 + $0x468] sm:$0xff] }
  0xa7   : > { %v2033_v21 = vpop.eup %2032  ;;  %1261 = vst [vmem:[%s3101_s17 + $0x318] sm:$0xff] %v2031_v19  ;;  %2052 = vtanh.f32 %v248_v16  ;;  %v280_v16 = vld [vmem:[%s3079_s30 + $0x470] sm:$0xff] }
  0xa8   : > { %v2035_v23 = vpop.eup %2034  ;;  %1262 = vst [vmem:[%s3101_s17 + $0x320] sm:$0xff] %v2033_v21  ;;  %2054 = vtanh.f32 %v249_v18  ;;  %v281_v18 = vld [vmem:[%s3079_s30 + $0x478] sm:$0xff] }
  0xa9   : > { %v2037_v25 = vpop.eup %2036  ;;  %1263 = vst [vmem:[%s3101_s17 + $0x328] sm:$0xff] %v2035_v23  ;;  %2056 = vtanh.f32 %v250_v20  ;;  %v282_v20 = vld [vmem:[%s3079_s30 + $0x480] sm:$0xff] }
  0xaa   : > { %v2039_v27 = vpop.eup %2038  ;;  %1264 = vst [vmem:[%s3101_s17 + $0x330] sm:$0xff] %v2037_v25  ;;  %2058 = vtanh.f32 %v251_v22  ;;  %v283_v22 = vld [vmem:[%s3079_s30 + $0x488] sm:$0xff] }
  0xab   : > { %v2041_v29 = vpop.eup %2040  ;;  %1265 = vst [vmem:[%s3101_s17 + $0x338] sm:$0xff] %v2039_v27  ;;  %2060 = vtanh.f32 %v252_v24  ;;  %v284_v24 = vld [vmem:[%s3079_s30 + $0x490] sm:$0xff] }
  0xac   : > { %v2043_v31 = vpop.eup %2042  ;;  %1266 = vst [vmem:[%s3101_s17 + $0x340] sm:$0xff] %v2041_v29  ;;  %2062 = vtanh.f32 %v253_v26  ;;  %v285_v26 = vld [vmem:[%s3079_s30 + $0x498] sm:$0xff] }
  0xad   : > { %v2045_v33 = vpop.eup %2044  ;;  %1267 = vst [vmem:[%s3101_s17 + $0x348] sm:$0xff] %v2043_v31  ;;  %2064 = vtanh.f32 %v254_v28  ;;  %v286_v28 = vld [vmem:[%s3079_s30 + $0x4a0] sm:$0xff] }
  0xae   : > { %v2047_v35 = vpop.eup %2046  ;;  %1268 = vst [vmem:[%s3101_s17 + $0x350] sm:$0xff] %v2045_v33  ;;  %2066 = vtanh.f32 %v255_v30  ;;  %v287_v30 = vld [vmem:[%s3079_s30 + $0x4a8] sm:$0xff] }
  0xaf   : > { %v2049_v37 = vpop.eup %2048  ;;  %1269 = vst [vmem:[%s3101_s17 + $0x358] sm:$0xff] %v2047_v35  ;;  %2068 = vtanh.f32 %v256_v32  ;;  %v288_v32 = vld [vmem:[%s3079_s30 + $0x4b0] sm:$0xff] }
  0xb0   : > { %v2051_v39 = vpop.eup %2050  ;;  %1270 = vst [vmem:[%s3101_s17 + $0x360] sm:$0xff] %v2049_v37  ;;  %2070 = vtanh.f32 %v257_v34  ;;  %v289_v34 = vld [vmem:[%s3079_s30 + $0x4b8] sm:$0xff] }
  0xb1   : > { %v2053_v41 = vpop.eup %2052  ;;  %1271 = vst [vmem:[%s3101_s17 + $0x368] sm:$0xff] %v2051_v39  ;;  %2072 = vtanh.f32 %v258_v36  ;;  %v290_v36 = vld [vmem:[%s3079_s30 + $0x4c0] sm:$0xff] }
  0xb2   : > { %v2055_v43 = vpop.eup %2054  ;;  %1272 = vst [vmem:[%s3101_s17 + $0x370] sm:$0xff] %v2053_v41  ;;  %2074 = vtanh.f32 %v259_v38  ;;  %v291_v38 = vld [vmem:[%s3079_s30 + $0x4c8] sm:$0xff] }
  0xb3   : > { %v2057_v45 = vpop.eup %2056  ;;  %1273 = vst [vmem:[%s3101_s17 + $0x378] sm:$0xff] %v2055_v43  ;;  %2076 = vtanh.f32 %v260_v40  ;;  %v292_v40 = vld [vmem:[%s3079_s30 + $0x4d0] sm:$0xff] }
  0xb4   : > { %v2059_v47 = vpop.eup %2058  ;;  %1274 = vst [vmem:[%s3101_s17 + $0x380] sm:$0xff] %v2057_v45  ;;  %2078 = vtanh.f32 %v261_v42  ;;  %v293_v42 = vld [vmem:[%s3079_s30 + $0x4d8] sm:$0xff] }
  0xb5   : > { %v2061_v49 = vpop.eup %2060  ;;  %1275 = vst [vmem:[%s3101_s17 + $0x388] sm:$0xff] %v2059_v47  ;;  %2080 = vtanh.f32 %v262_v44  ;;  %v294_v44 = vld [vmem:[%s3079_s30 + $0x4e0] sm:$0xff] }
  0xb6   : > { %v2063_v51 = vpop.eup %2062  ;;  %1276 = vst [vmem:[%s3101_s17 + $0x390] sm:$0xff] %v2061_v49  ;;  %2082 = vtanh.f32 %v263_v46  ;;  %v295_v46 = vld [vmem:[%s3079_s30 + $0x4e8] sm:$0xff] }
  0xb7   : > { %v2065_v53 = vpop.eup %2064  ;;  %1277 = vst [vmem:[%s3101_s17 + $0x398] sm:$0xff] %v2063_v51  ;;  %2084 = vtanh.f32 %v264_v48  ;;  %v296_v48 = vld [vmem:[%s3079_s30 + $0x4f0] sm:$0xff] }
  0xb8   : > { %v2067_v55 = vpop.eup %2066  ;;  %1278 = vst [vmem:[%s3101_s17 + $0x3a0] sm:$0xff] %v2065_v53  ;;  %2086 = vtanh.f32 %v265_v50  ;;  %v297_v50 = vld [vmem:[%s3079_s30 + $0x4f8] sm:$0xff] }
  0xb9   : > { %v2069_v57 = vpop.eup %2068  ;;  %1279 = vst [vmem:[%s3101_s17 + $0x3a8] sm:$0xff] %v2067_v55  ;;  %2088 = vtanh.f32 %v266_v52  ;;  %v298_v52 = vld [vmem:[%s3079_s30 + $0x500] sm:$0xff] }
  0xba   : > { %v2071_v59 = vpop.eup %2070  ;;  %1280 = vst [vmem:[%s3101_s17 + $0x3b0] sm:$0xff] %v2069_v57  ;;  %2090 = vtanh.f32 %v267_v54  ;;  %v299_v54 = vld [vmem:[%s3079_s30 + $0x508] sm:$0xff] }
  0xbb   : > { %v2073_v61 = vpop.eup %2072  ;;  %1281 = vst [vmem:[%s3101_s17 + $0x3b8] sm:$0xff] %v2071_v59  ;;  %2092 = vtanh.f32 %v268_v56  ;;  %v300_v56 = vld [vmem:[%s3079_s30 + $0x510] sm:$0xff] }
  0xbc   : > { %v2075_v63 = vpop.eup %2074  ;;  %1282 = vst [vmem:[%s3101_s17 + $0x3c0] sm:$0xff] %v2073_v61  ;;  %2094 = vtanh.f32 %v269_v58  ;;  %v301_v58 = vld [vmem:[%s3079_s30 + $0x518] sm:$0xff] }
  0xbd   : > { %v2077_v1 = vpop.eup %2076  ;;  %1283 = vst [vmem:[%s3101_s17 + $0x3c8] sm:$0xff] %v2075_v63  ;;  %2096 = vtanh.f32 %v270_v60  ;;  %v302_v60 = vld [vmem:[%s3079_s30 + $0x520] sm:$0xff] }
  0xbe   : > { %v2079_v3 = vpop.eup %2078  ;;  %1284 = vst [vmem:[%s3101_s17 + $0x3d0] sm:$0xff] %v2077_v1  ;;  %2098 = vtanh.f32 %v271_v62  ;;  %v303_v62 = vld [vmem:[%s3079_s30 + $0x528] sm:$0xff] }
  0xbf   : > { %v2081_v5 = vpop.eup %2080  ;;  %1285 = vst [vmem:[%s3101_s17 + $0x3d8] sm:$0xff] %v2079_v3  ;;  %2100 = vtanh.f32 %v272_v0  ;;  %v304_v0 = vld [vmem:[%s3079_s30 + $0x530] sm:$0xff] }
  0xc0   : > { %v2083_v7 = vpop.eup %2082  ;;  %1286 = vst [vmem:[%s3101_s17 + $0x3e0] sm:$0xff] %v2081_v5  ;;  %2102 = vtanh.f32 %v273_v2  ;;  %v305_v2 = vld [vmem:[%s3079_s30 + $0x538] sm:$0xff] }
  0xc1   : > { %v2085_v9 = vpop.eup %2084  ;;  %1287 = vst [vmem:[%s3101_s17 + $0x3e8] sm:$0xff] %v2083_v7  ;;  %2104 = vtanh.f32 %v274_v4  ;;  %v306_v4 = vld [vmem:[%s3079_s30 + $0x540] sm:$0xff] }
  0xc2   : > { %v2087_v11 = vpop.eup %2086  ;;  %1288 = vst [vmem:[%s3101_s17 + $0x3f0] sm:$0xff] %v2085_v9  ;;  %2106 = vtanh.f32 %v275_v6  ;;  %v307_v6 = vld [vmem:[%s3079_s30 + $0x548] sm:$0xff] }
  0xc3   : > { %v2089_v13 = vpop.eup %2088  ;;  %1289 = vst [vmem:[%s3101_s17 + $0x3f8] sm:$0xff] %v2087_v11  ;;  %2108 = vtanh.f32 %v276_v8  ;;  %v308_v8 = vld [vmem:[%s3079_s30 + $0x550] sm:$0xff] }
  0xc4   : > { %v2091_v15 = vpop.eup %2090  ;;  %1290 = vst [vmem:[%s3101_s17 + $0x400] sm:$0xff] %v2089_v13  ;;  %2110 = vtanh.f32 %v277_v10  ;;  %v309_v10 = vld [vmem:[%s3079_s30 + $0x558] sm:$0xff] }
  0xc5   : > { %v2093_v17 = vpop.eup %2092  ;;  %1291 = vst [vmem:[%s3101_s17 + $0x408] sm:$0xff] %v2091_v15  ;;  %2112 = vtanh.f32 %v278_v12  ;;  %v310_v12 = vld [vmem:[%s3079_s30 + $0x560] sm:$0xff] }
  0xc6   : > { %v2095_v19 = vpop.eup %2094  ;;  %1292 = vst [vmem:[%s3101_s17 + $0x410] sm:$0xff] %v2093_v17  ;;  %2114 = vtanh.f32 %v279_v14  ;;  %v311_v14 = vld [vmem:[%s3079_s30 + $0x568] sm:$0xff] }
  0xc7   : > { %v2097_v21 = vpop.eup %2096  ;;  %1293 = vst [vmem:[%s3101_s17 + $0x418] sm:$0xff] %v2095_v19  ;;  %2116 = vtanh.f32 %v280_v16  ;;  %v312_v16 = vld [vmem:[%s3079_s30 + $0x570] sm:$0xff] }
  0xc8   : > { %v2099_v23 = vpop.eup %2098  ;;  %1294 = vst [vmem:[%s3101_s17 + $0x420] sm:$0xff] %v2097_v21  ;;  %2118 = vtanh.f32 %v281_v18  ;;  %v313_v18 = vld [vmem:[%s3079_s30 + $0x578] sm:$0xff] }
  0xc9   : > { %v2101_v25 = vpop.eup %2100  ;;  %1295 = vst [vmem:[%s3101_s17 + $0x428] sm:$0xff] %v2099_v23  ;;  %2120 = vtanh.f32 %v282_v20  ;;  %v314_v20 = vld [vmem:[%s3079_s30 + $0x580] sm:$0xff] }
  0xca   : > { %v2103_v27 = vpop.eup %2102  ;;  %1296 = vst [vmem:[%s3101_s17 + $0x430] sm:$0xff] %v2101_v25  ;;  %2122 = vtanh.f32 %v283_v22  ;;  %v315_v22 = vld [vmem:[%s3079_s30 + $0x588] sm:$0xff] }
  0xcb   : > { %v2105_v29 = vpop.eup %2104  ;;  %1297 = vst [vmem:[%s3101_s17 + $0x438] sm:$0xff] %v2103_v27  ;;  %2124 = vtanh.f32 %v284_v24  ;;  %v316_v24 = vld [vmem:[%s3079_s30 + $0x590] sm:$0xff] }
  0xcc   : > { %v2107_v31 = vpop.eup %2106  ;;  %1298 = vst [vmem:[%s3101_s17 + $0x440] sm:$0xff] %v2105_v29  ;;  %2126 = vtanh.f32 %v285_v26  ;;  %v317_v26 = vld [vmem:[%s3079_s30 + $0x598] sm:$0xff] }
  0xcd   : > { %v2109_v33 = vpop.eup %2108  ;;  %1299 = vst [vmem:[%s3101_s17 + $0x448] sm:$0xff] %v2107_v31  ;;  %2128 = vtanh.f32 %v286_v28  ;;  %v318_v28 = vld [vmem:[%s3079_s30 + $0x5a0] sm:$0xff] }
  0xce   : > { %v2111_v35 = vpop.eup %2110  ;;  %1300 = vst [vmem:[%s3101_s17 + $0x450] sm:$0xff] %v2109_v33  ;;  %2130 = vtanh.f32 %v287_v30  ;;  %v319_v30 = vld [vmem:[%s3079_s30 + $0x5a8] sm:$0xff] }
  0xcf   : > { %v2113_v37 = vpop.eup %2112  ;;  %1301 = vst [vmem:[%s3101_s17 + $0x458] sm:$0xff] %v2111_v35  ;;  %2132 = vtanh.f32 %v288_v32  ;;  %v320_v32 = vld [vmem:[%s3079_s30 + $0x5b0] sm:$0xff] }
  0xd0   : > { %v2115_v39 = vpop.eup %2114  ;;  %1302 = vst [vmem:[%s3101_s17 + $0x460] sm:$0xff] %v2113_v37  ;;  %2134 = vtanh.f32 %v289_v34  ;;  %v321_v34 = vld [vmem:[%s3079_s30 + $0x5b8] sm:$0xff] }
  0xd1   : > { %v2117_v41 = vpop.eup %2116  ;;  %1303 = vst [vmem:[%s3101_s17 + $0x468] sm:$0xff] %v2115_v39  ;;  %2136 = vtanh.f32 %v290_v36  ;;  %v322_v36 = vld [vmem:[%s3079_s30 + $0x5c0] sm:$0xff] }
  0xd2   : > { %v2119_v43 = vpop.eup %2118  ;;  %1304 = vst [vmem:[%s3101_s17 + $0x470] sm:$0xff] %v2117_v41  ;;  %2138 = vtanh.f32 %v291_v38  ;;  %v323_v38 = vld [vmem:[%s3079_s30 + $0x5c8] sm:$0xff] }
  0xd3   : > { %v2121_v45 = vpop.eup %2120  ;;  %1305 = vst [vmem:[%s3101_s17 + $0x478] sm:$0xff] %v2119_v43  ;;  %2140 = vtanh.f32 %v292_v40  ;;  %v324_v40 = vld [vmem:[%s3079_s30 + $0x5d0] sm:$0xff] }
  0xd4   : > { %v2123_v47 = vpop.eup %2122  ;;  %1306 = vst [vmem:[%s3101_s17 + $0x480] sm:$0xff] %v2121_v45  ;;  %2142 = vtanh.f32 %v293_v42  ;;  %v325_v42 = vld [vmem:[%s3079_s30 + $0x5d8] sm:$0xff] }
  0xd5   : > { %v2125_v49 = vpop.eup %2124  ;;  %1307 = vst [vmem:[%s3101_s17 + $0x488] sm:$0xff] %v2123_v47  ;;  %2144 = vtanh.f32 %v294_v44  ;;  %v326_v44 = vld [vmem:[%s3079_s30 + $0x5e0] sm:$0xff] }
  0xd6   : > { %v2127_v51 = vpop.eup %2126  ;;  %1308 = vst [vmem:[%s3101_s17 + $0x490] sm:$0xff] %v2125_v49  ;;  %2146 = vtanh.f32 %v295_v46  ;;  %v327_v46 = vld [vmem:[%s3079_s30 + $0x5e8] sm:$0xff] }
  0xd7   : > { %v2129_v53 = vpop.eup %2128  ;;  %1309 = vst [vmem:[%s3101_s17 + $0x498] sm:$0xff] %v2127_v51  ;;  %2148 = vtanh.f32 %v296_v48  ;;  %v328_v48 = vld [vmem:[%s3079_s30 + $0x5f0] sm:$0xff] }
  0xd8   : > { %v2131_v55 = vpop.eup %2130  ;;  %1310 = vst [vmem:[%s3101_s17 + $0x4a0] sm:$0xff] %v2129_v53  ;;  %2150 = vtanh.f32 %v297_v50  ;;  %v329_v50 = vld [vmem:[%s3079_s30 + $0x5f8] sm:$0xff] }
  0xd9   : > { %v2133_v57 = vpop.eup %2132  ;;  %1311 = vst [vmem:[%s3101_s17 + $0x4a8] sm:$0xff] %v2131_v55  ;;  %2152 = vtanh.f32 %v298_v52  ;;  %v330_v52 = vld [vmem:[%s3079_s30 + $0x600] sm:$0xff] }
  0xda   : > { %v2135_v59 = vpop.eup %2134  ;;  %1312 = vst [vmem:[%s3101_s17 + $0x4b0] sm:$0xff] %v2133_v57  ;;  %2154 = vtanh.f32 %v299_v54  ;;  %v331_v54 = vld [vmem:[%s3079_s30 + $0x608] sm:$0xff] }
  0xdb   : > { %v2137_v61 = vpop.eup %2136  ;;  %1313 = vst [vmem:[%s3101_s17 + $0x4b8] sm:$0xff] %v2135_v59  ;;  %2156 = vtanh.f32 %v300_v56  ;;  %v332_v56 = vld [vmem:[%s3079_s30 + $0x610] sm:$0xff] }
  0xdc   : > { %v2139_v63 = vpop.eup %2138  ;;  %1314 = vst [vmem:[%s3101_s17 + $0x4c0] sm:$0xff] %v2137_v61  ;;  %2158 = vtanh.f32 %v301_v58  ;;  %v333_v58 = vld [vmem:[%s3079_s30 + $0x618] sm:$0xff] }
  0xdd   : > { %v2141_v1 = vpop.eup %2140  ;;  %1315 = vst [vmem:[%s3101_s17 + $0x4c8] sm:$0xff] %v2139_v63  ;;  %2160 = vtanh.f32 %v302_v60  ;;  %v334_v60 = vld [vmem:[%s3079_s30 + $0x620] sm:$0xff] }
  0xde   : > { %v2143_v3 = vpop.eup %2142  ;;  %1316 = vst [vmem:[%s3101_s17 + $0x4d0] sm:$0xff] %v2141_v1  ;;  %2162 = vtanh.f32 %v303_v62  ;;  %v335_v62 = vld [vmem:[%s3079_s30 + $0x628] sm:$0xff] }
  0xdf   : > { %v2145_v5 = vpop.eup %2144  ;;  %1317 = vst [vmem:[%s3101_s17 + $0x4d8] sm:$0xff] %v2143_v3  ;;  %2164 = vtanh.f32 %v304_v0  ;;  %v336_v0 = vld [vmem:[%s3079_s30 + $0x630] sm:$0xff] }
  0xe0   : > { %v2147_v7 = vpop.eup %2146  ;;  %1318 = vst [vmem:[%s3101_s17 + $0x4e0] sm:$0xff] %v2145_v5  ;;  %2166 = vtanh.f32 %v305_v2  ;;  %v337_v2 = vld [vmem:[%s3079_s30 + $0x638] sm:$0xff] }
  0xe1   : > { %v2149_v9 = vpop.eup %2148  ;;  %1319 = vst [vmem:[%s3101_s17 + $0x4e8] sm:$0xff] %v2147_v7  ;;  %2168 = vtanh.f32 %v306_v4  ;;  %v338_v4 = vld [vmem:[%s3079_s30 + $0x640] sm:$0xff] }
  0xe2   : > { %v2151_v11 = vpop.eup %2150  ;;  %1320 = vst [vmem:[%s3101_s17 + $0x4f0] sm:$0xff] %v2149_v9  ;;  %2170 = vtanh.f32 %v307_v6  ;;  %v339_v6 = vld [vmem:[%s3079_s30 + $0x648] sm:$0xff] }
  0xe3   : > { %v2153_v13 = vpop.eup %2152  ;;  %1321 = vst [vmem:[%s3101_s17 + $0x4f8] sm:$0xff] %v2151_v11  ;;  %2172 = vtanh.f32 %v308_v8  ;;  %v340_v8 = vld [vmem:[%s3079_s30 + $0x650] sm:$0xff] }
  0xe4   : > { %v2155_v15 = vpop.eup %2154  ;;  %1322 = vst [vmem:[%s3101_s17 + $0x500] sm:$0xff] %v2153_v13  ;;  %2174 = vtanh.f32 %v309_v10  ;;  %v341_v10 = vld [vmem:[%s3079_s30 + $0x658] sm:$0xff] }
  0xe5   : > { %v2157_v17 = vpop.eup %2156  ;;  %1323 = vst [vmem:[%s3101_s17 + $0x508] sm:$0xff] %v2155_v15  ;;  %2176 = vtanh.f32 %v310_v12  ;;  %v342_v12 = vld [vmem:[%s3079_s30 + $0x660] sm:$0xff] }
  0xe6   : > { %v2159_v19 = vpop.eup %2158  ;;  %1324 = vst [vmem:[%s3101_s17 + $0x510] sm:$0xff] %v2157_v17  ;;  %2178 = vtanh.f32 %v311_v14  ;;  %v343_v14 = vld [vmem:[%s3079_s30 + $0x668] sm:$0xff] }
  0xe7   : > { %v2161_v21 = vpop.eup %2160  ;;  %1325 = vst [vmem:[%s3101_s17 + $0x518] sm:$0xff] %v2159_v19  ;;  %2180 = vtanh.f32 %v312_v16  ;;  %v344_v16 = vld [vmem:[%s3079_s30 + $0x670] sm:$0xff] }
  0xe8   : > { %v2163_v23 = vpop.eup %2162  ;;  %1326 = vst [vmem:[%s3101_s17 + $0x520] sm:$0xff] %v2161_v21  ;;  %2182 = vtanh.f32 %v313_v18  ;;  %v345_v18 = vld [vmem:[%s3079_s30 + $0x678] sm:$0xff] }
  0xe9   : > { %v2165_v25 = vpop.eup %2164  ;;  %1327 = vst [vmem:[%s3101_s17 + $0x528] sm:$0xff] %v2163_v23  ;;  %2184 = vtanh.f32 %v314_v20  ;;  %v346_v20 = vld [vmem:[%s3079_s30 + $0x680] sm:$0xff] }
  0xea   : > { %v2167_v27 = vpop.eup %2166  ;;  %1328 = vst [vmem:[%s3101_s17 + $0x530] sm:$0xff] %v2165_v25  ;;  %2186 = vtanh.f32 %v315_v22  ;;  %v347_v22 = vld [vmem:[%s3079_s30 + $0x688] sm:$0xff] }
  0xeb   : > { %v2169_v29 = vpop.eup %2168  ;;  %1329 = vst [vmem:[%s3101_s17 + $0x538] sm:$0xff] %v2167_v27  ;;  %2188 = vtanh.f32 %v316_v24  ;;  %v348_v24 = vld [vmem:[%s3079_s30 + $0x690] sm:$0xff] }
  0xec   : > { %v2171_v31 = vpop.eup %2170  ;;  %1330 = vst [vmem:[%s3101_s17 + $0x540] sm:$0xff] %v2169_v29  ;;  %2190 = vtanh.f32 %v317_v26  ;;  %v349_v26 = vld [vmem:[%s3079_s30 + $0x698] sm:$0xff] }
  0xed   : > { %v2173_v33 = vpop.eup %2172  ;;  %1331 = vst [vmem:[%s3101_s17 + $0x548] sm:$0xff] %v2171_v31  ;;  %2192 = vtanh.f32 %v318_v28  ;;  %v350_v28 = vld [vmem:[%s3079_s30 + $0x6a0] sm:$0xff] }
  0xee   : > { %v2175_v35 = vpop.eup %2174  ;;  %1332 = vst [vmem:[%s3101_s17 + $0x550] sm:$0xff] %v2173_v33  ;;  %2194 = vtanh.f32 %v319_v30  ;;  %v351_v30 = vld [vmem:[%s3079_s30 + $0x6a8] sm:$0xff] }
  0xef   : > { %v2177_v37 = vpop.eup %2176  ;;  %1333 = vst [vmem:[%s3101_s17 + $0x558] sm:$0xff] %v2175_v35  ;;  %2196 = vtanh.f32 %v320_v32  ;;  %v352_v32 = vld [vmem:[%s3079_s30 + $0x6b0] sm:$0xff] }
  0xf0   : > { %v2179_v39 = vpop.eup %2178  ;;  %1334 = vst [vmem:[%s3101_s17 + $0x560] sm:$0xff] %v2177_v37  ;;  %2198 = vtanh.f32 %v321_v34  ;;  %v353_v34 = vld [vmem:[%s3079_s30 + $0x6b8] sm:$0xff] }
  0xf1   : > { %v2181_v41 = vpop.eup %2180  ;;  %1335 = vst [vmem:[%s3101_s17 + $0x568] sm:$0xff] %v2179_v39  ;;  %2200 = vtanh.f32 %v322_v36  ;;  %v354_v36 = vld [vmem:[%s3079_s30 + $0x6c0] sm:$0xff] }
  0xf2   : > { %v2183_v43 = vpop.eup %2182  ;;  %1336 = vst [vmem:[%s3101_s17 + $0x570] sm:$0xff] %v2181_v41  ;;  %2202 = vtanh.f32 %v323_v38  ;;  %v355_v38 = vld [vmem:[%s3079_s30 + $0x6c8] sm:$0xff] }
  0xf3   : > { %v2185_v45 = vpop.eup %2184  ;;  %1337 = vst [vmem:[%s3101_s17 + $0x578] sm:$0xff] %v2183_v43  ;;  %2204 = vtanh.f32 %v324_v40  ;;  %v356_v40 = vld [vmem:[%s3079_s30 + $0x6d0] sm:$0xff] }
  0xf4   : > { %v2187_v47 = vpop.eup %2186  ;;  %1338 = vst [vmem:[%s3101_s17 + $0x580] sm:$0xff] %v2185_v45  ;;  %2206 = vtanh.f32 %v325_v42  ;;  %v357_v42 = vld [vmem:[%s3079_s30 + $0x6d8] sm:$0xff] }
  0xf5   : > { %v2189_v49 = vpop.eup %2188  ;;  %1339 = vst [vmem:[%s3101_s17 + $0x588] sm:$0xff] %v2187_v47  ;;  %2208 = vtanh.f32 %v326_v44  ;;  %v358_v44 = vld [vmem:[%s3079_s30 + $0x6e0] sm:$0xff] }
  0xf6   : > { %v2191_v51 = vpop.eup %2190  ;;  %1340 = vst [vmem:[%s3101_s17 + $0x590] sm:$0xff] %v2189_v49  ;;  %2210 = vtanh.f32 %v327_v46  ;;  %v359_v46 = vld [vmem:[%s3079_s30 + $0x6e8] sm:$0xff] }
  0xf7   : > { %v2193_v53 = vpop.eup %2192  ;;  %1341 = vst [vmem:[%s3101_s17 + $0x598] sm:$0xff] %v2191_v51  ;;  %2212 = vtanh.f32 %v328_v48  ;;  %v360_v48 = vld [vmem:[%s3079_s30 + $0x6f0] sm:$0xff] }
  0xf8   : > { %v2195_v55 = vpop.eup %2194  ;;  %1342 = vst [vmem:[%s3101_s17 + $0x5a0] sm:$0xff] %v2193_v53  ;;  %2214 = vtanh.f32 %v329_v50  ;;  %v361_v50 = vld [vmem:[%s3079_s30 + $0x6f8] sm:$0xff] }
  0xf9   : > { %v2197_v57 = vpop.eup %2196  ;;  %1343 = vst [vmem:[%s3101_s17 + $0x5a8] sm:$0xff] %v2195_v55  ;;  %2216 = vtanh.f32 %v330_v52  ;;  %v362_v52 = vld [vmem:[%s3079_s30 + $0x700] sm:$0xff] }
  0xfa   : > { %v2199_v59 = vpop.eup %2198  ;;  %1344 = vst [vmem:[%s3101_s17 + $0x5b0] sm:$0xff] %v2197_v57  ;;  %2218 = vtanh.f32 %v331_v54  ;;  %v363_v54 = vld [vmem:[%s3079_s30 + $0x708] sm:$0xff] }
  0xfb   : > { %v2201_v61 = vpop.eup %2200  ;;  %1345 = vst [vmem:[%s3101_s17 + $0x5b8] sm:$0xff] %v2199_v59  ;;  %2220 = vtanh.f32 %v332_v56  ;;  %v364_v56 = vld [vmem:[%s3079_s30 + $0x710] sm:$0xff] }
  0xfc   : > { %v2203_v63 = vpop.eup %2202  ;;  %1346 = vst [vmem:[%s3101_s17 + $0x5c0] sm:$0xff] %v2201_v61  ;;  %2222 = vtanh.f32 %v333_v58  ;;  %v365_v58 = vld [vmem:[%s3079_s30 + $0x718] sm:$0xff] }
  0xfd   : > { %v2205_v1 = vpop.eup %2204  ;;  %1347 = vst [vmem:[%s3101_s17 + $0x5c8] sm:$0xff] %v2203_v63  ;;  %2224 = vtanh.f32 %v334_v60  ;;  %v366_v60 = vld [vmem:[%s3079_s30 + $0x720] sm:$0xff] }
  0xfe   : > { %v2207_v3 = vpop.eup %2206  ;;  %1348 = vst [vmem:[%s3101_s17 + $0x5d0] sm:$0xff] %v2205_v1  ;;  %2226 = vtanh.f32 %v335_v62  ;;  %v367_v62 = vld [vmem:[%s3079_s30 + $0x728] sm:$0xff] }
  0xff   : > { %v2209_v5 = vpop.eup %2208  ;;  %1349 = vst [vmem:[%s3101_s17 + $0x5d8] sm:$0xff] %v2207_v3  ;;  %2228 = vtanh.f32 %v336_v0  ;;  %v368_v0 = vld [vmem:[%s3079_s30 + $0x730] sm:$0xff] }
 0x100   : > { %v2211_v7 = vpop.eup %2210  ;;  %1350 = vst [vmem:[%s3101_s17 + $0x5e0] sm:$0xff] %v2209_v5  ;;  %2230 = vtanh.f32 %v337_v2  ;;  %v369_v2 = vld [vmem:[%s3079_s30 + $0x738] sm:$0xff] }
 0x101   : > { %v2213_v9 = vpop.eup %2212  ;;  %1351 = vst [vmem:[%s3101_s17 + $0x5e8] sm:$0xff] %v2211_v7  ;;  %2232 = vtanh.f32 %v338_v4  ;;  %v370_v4 = vld [vmem:[%s3079_s30 + $0x740] sm:$0xff] }
 0x102   : > { %v2215_v11 = vpop.eup %2214  ;;  %1352 = vst [vmem:[%s3101_s17 + $0x5f0] sm:$0xff] %v2213_v9  ;;  %2234 = vtanh.f32 %v339_v6  ;;  %v371_v6 = vld [vmem:[%s3079_s30 + $0x748] sm:$0xff] }
 0x103   : > { %v2217_v13 = vpop.eup %2216  ;;  %1353 = vst [vmem:[%s3101_s17 + $0x5f8] sm:$0xff] %v2215_v11  ;;  %2236 = vtanh.f32 %v340_v8  ;;  %v372_v8 = vld [vmem:[%s3079_s30 + $0x750] sm:$0xff] }
 0x104   : > { %v2219_v15 = vpop.eup %2218  ;;  %1354 = vst [vmem:[%s3101_s17 + $0x600] sm:$0xff] %v2217_v13  ;;  %2238 = vtanh.f32 %v341_v10  ;;  %v373_v10 = vld [vmem:[%s3079_s30 + $0x758] sm:$0xff] }
 0x105   : > { %v2221_v17 = vpop.eup %2220  ;;  %1355 = vst [vmem:[%s3101_s17 + $0x608] sm:$0xff] %v2219_v15  ;;  %2240 = vtanh.f32 %v342_v12  ;;  %v374_v12 = vld [vmem:[%s3079_s30 + $0x760] sm:$0xff] }
 0x106   : > { %v2223_v19 = vpop.eup %2222  ;;  %1356 = vst [vmem:[%s3101_s17 + $0x610] sm:$0xff] %v2221_v17  ;;  %2242 = vtanh.f32 %v343_v14  ;;  %v375_v14 = vld [vmem:[%s3079_s30 + $0x768] sm:$0xff] }
 0x107   : > { %v2225_v21 = vpop.eup %2224  ;;  %1357 = vst [vmem:[%s3101_s17 + $0x618] sm:$0xff] %v2223_v19  ;;  %2244 = vtanh.f32 %v344_v16  ;;  %v376_v16 = vld [vmem:[%s3079_s30 + $0x770] sm:$0xff] }
 0x108   : > { %v2227_v23 = vpop.eup %2226  ;;  %1358 = vst [vmem:[%s3101_s17 + $0x620] sm:$0xff] %v2225_v21  ;;  %2246 = vtanh.f32 %v345_v18  ;;  %v377_v18 = vld [vmem:[%s3079_s30 + $0x778] sm:$0xff] }
 0x109   : > { %v2229_v25 = vpop.eup %2228  ;;  %1359 = vst [vmem:[%s3101_s17 + $0x628] sm:$0xff] %v2227_v23  ;;  %2248 = vtanh.f32 %v346_v20  ;;  %v378_v20 = vld [vmem:[%s3079_s30 + $0x780] sm:$0xff] }
 0x10a   : > { %v2231_v27 = vpop.eup %2230  ;;  %1360 = vst [vmem:[%s3101_s17 + $0x630] sm:$0xff] %v2229_v25  ;;  %2250 = vtanh.f32 %v347_v22  ;;  %v379_v22 = vld [vmem:[%s3079_s30 + $0x788] sm:$0xff] }
 0x10b   : > { %v2233_v29 = vpop.eup %2232  ;;  %1361 = vst [vmem:[%s3101_s17 + $0x638] sm:$0xff] %v2231_v27  ;;  %2252 = vtanh.f32 %v348_v24  ;;  %v380_v24 = vld [vmem:[%s3079_s30 + $0x790] sm:$0xff] }
 0x10c   : > { %v2235_v31 = vpop.eup %2234  ;;  %1362 = vst [vmem:[%s3101_s17 + $0x640] sm:$0xff] %v2233_v29  ;;  %2254 = vtanh.f32 %v349_v26  ;;  %v381_v26 = vld [vmem:[%s3079_s30 + $0x798] sm:$0xff] }
 0x10d   : > { %v2237_v33 = vpop.eup %2236  ;;  %1363 = vst [vmem:[%s3101_s17 + $0x648] sm:$0xff] %v2235_v31  ;;  %2256 = vtanh.f32 %v350_v28  ;;  %v382_v28 = vld [vmem:[%s3079_s30 + $0x7a0] sm:$0xff] }
 0x10e   : > { %v2239_v35 = vpop.eup %2238  ;;  %1364 = vst [vmem:[%s3101_s17 + $0x650] sm:$0xff] %v2237_v33  ;;  %2258 = vtanh.f32 %v351_v30  ;;  %v383_v30 = vld [vmem:[%s3079_s30 + $0x7a8] sm:$0xff] }
 0x10f   : > { %v2241_v37 = vpop.eup %2240  ;;  %1365 = vst [vmem:[%s3101_s17 + $0x658] sm:$0xff] %v2239_v35  ;;  %2260 = vtanh.f32 %v352_v32  ;;  %v384_v32 = vld [vmem:[%s3079_s30 + $0x7b0] sm:$0xff] }
 0x110   : > { %v2243_v39 = vpop.eup %2242  ;;  %1366 = vst [vmem:[%s3101_s17 + $0x660] sm:$0xff] %v2241_v37  ;;  %2262 = vtanh.f32 %v353_v34  ;;  %v385_v34 = vld [vmem:[%s3079_s30 + $0x7b8] sm:$0xff] }
 0x111   : > { %v2245_v41 = vpop.eup %2244  ;;  %1367 = vst [vmem:[%s3101_s17 + $0x668] sm:$0xff] %v2243_v39  ;;  %2264 = vtanh.f32 %v354_v36  ;;  %v386_v36 = vld [vmem:[%s3079_s30 + $0x7c0] sm:$0xff] }
 0x112   : > { %v2247_v43 = vpop.eup %2246  ;;  %1368 = vst [vmem:[%s3101_s17 + $0x670] sm:$0xff] %v2245_v41  ;;  %2266 = vtanh.f32 %v355_v38  ;;  %v387_v38 = vld [vmem:[%s3079_s30 + $0x7c8] sm:$0xff] }
 0x113   : > { %v2249_v45 = vpop.eup %2248  ;;  %1369 = vst [vmem:[%s3101_s17 + $0x678] sm:$0xff] %v2247_v43  ;;  %2268 = vtanh.f32 %v356_v40  ;;  %v388_v40 = vld [vmem:[%s3079_s30 + $0x7d0] sm:$0xff] }
 0x114   : > { %v2251_v47 = vpop.eup %2250  ;;  %1370 = vst [vmem:[%s3101_s17 + $0x680] sm:$0xff] %v2249_v45  ;;  %2270 = vtanh.f32 %v357_v42  ;;  %v389_v42 = vld [vmem:[%s3079_s30 + $0x7d8] sm:$0xff] }
 0x115   : > { %v2253_v49 = vpop.eup %2252  ;;  %1371 = vst [vmem:[%s3101_s17 + $0x688] sm:$0xff] %v2251_v47  ;;  %2272 = vtanh.f32 %v358_v44  ;;  %v390_v44 = vld [vmem:[%s3079_s30 + $0x7e0] sm:$0xff] }
 0x116   : > { %v2255_v51 = vpop.eup %2254  ;;  %1372 = vst [vmem:[%s3101_s17 + $0x690] sm:$0xff] %v2253_v49  ;;  %2274 = vtanh.f32 %v359_v46  ;;  %v391_v46 = vld [vmem:[%s3079_s30 + $0x7e8] sm:$0xff] }
 0x117   : > { %v2257_v53 = vpop.eup %2256  ;;  %1373 = vst [vmem:[%s3101_s17 + $0x698] sm:$0xff] %v2255_v51  ;;  %2276 = vtanh.f32 %v360_v48  ;;  %v392_v48 = vld [vmem:[%s3079_s30 + $0x7f0] sm:$0xff] }
 0x118   : > { %v2259_v55 = vpop.eup %2258  ;;  %1374 = vst [vmem:[%s3101_s17 + $0x6a0] sm:$0xff] %v2257_v53  ;;  %2278 = vtanh.f32 %v361_v50  ;;  %v393_v50 = vld [vmem:[%s3079_s30 + $0x7f8] sm:$0xff] }
 0x119   : > { %v2261_v57 = vpop.eup %2260  ;;  %1375 = vst [vmem:[%s3101_s17 + $0x6a8] sm:$0xff] %v2259_v55  ;;  %2280 = vtanh.f32 %v362_v52  ;;  %v394_v52 = vld [vmem:[%s3079_s30 + $0x800] sm:$0xff] }
 0x11a   : > { %v2263_v59 = vpop.eup %2262  ;;  %1376 = vst [vmem:[%s3101_s17 + $0x6b0] sm:$0xff] %v2261_v57  ;;  %2282 = vtanh.f32 %v363_v54  ;;  %v395_v54 = vld [vmem:[%s3079_s30 + $0x808] sm:$0xff] }
 0x11b   : > { %v2265_v61 = vpop.eup %2264  ;;  %1377 = vst [vmem:[%s3101_s17 + $0x6b8] sm:$0xff] %v2263_v59  ;;  %2284 = vtanh.f32 %v364_v56  ;;  %v396_v56 = vld [vmem:[%s3079_s30 + $0x810] sm:$0xff] }
 0x11c   : > { %v2267_v63 = vpop.eup %2266  ;;  %1378 = vst [vmem:[%s3101_s17 + $0x6c0] sm:$0xff] %v2265_v61  ;;  %2286 = vtanh.f32 %v365_v58  ;;  %v397_v58 = vld [vmem:[%s3079_s30 + $0x818] sm:$0xff] }
 0x11d   : > { %v2269_v1 = vpop.eup %2268  ;;  %1379 = vst [vmem:[%s3101_s17 + $0x6c8] sm:$0xff] %v2267_v63  ;;  %2288 = vtanh.f32 %v366_v60  ;;  %v398_v60 = vld [vmem:[%s3079_s30 + $0x820] sm:$0xff] }
 0x11e   : > { %v2271_v3 = vpop.eup %2270  ;;  %1380 = vst [vmem:[%s3101_s17 + $0x6d0] sm:$0xff] %v2269_v1  ;;  %2290 = vtanh.f32 %v367_v62  ;;  %v399_v62 = vld [vmem:[%s3079_s30 + $0x828] sm:$0xff] }
 0x11f   : > { %v2273_v5 = vpop.eup %2272  ;;  %1381 = vst [vmem:[%s3101_s17 + $0x6d8] sm:$0xff] %v2271_v3  ;;  %2292 = vtanh.f32 %v368_v0  ;;  %v400_v0 = vld [vmem:[%s3079_s30 + $0x830] sm:$0xff] }
 0x120   : > { %v2275_v7 = vpop.eup %2274  ;;  %1382 = vst [vmem:[%s3101_s17 + $0x6e0] sm:$0xff] %v2273_v5  ;;  %2294 = vtanh.f32 %v369_v2  ;;  %v401_v2 = vld [vmem:[%s3079_s30 + $0x838] sm:$0xff] }
 0x121   : > { %v2277_v9 = vpop.eup %2276  ;;  %1383 = vst [vmem:[%s3101_s17 + $0x6e8] sm:$0xff] %v2275_v7  ;;  %2296 = vtanh.f32 %v370_v4  ;;  %v402_v4 = vld [vmem:[%s3079_s30 + $0x840] sm:$0xff] }
 0x122   : > { %v2279_v11 = vpop.eup %2278  ;;  %1384 = vst [vmem:[%s3101_s17 + $0x6f0] sm:$0xff] %v2277_v9  ;;  %2298 = vtanh.f32 %v371_v6  ;;  %v403_v6 = vld [vmem:[%s3079_s30 + $0x848] sm:$0xff] }
 0x123   : > { %v2281_v13 = vpop.eup %2280  ;;  %1385 = vst [vmem:[%s3101_s17 + $0x6f8] sm:$0xff] %v2279_v11  ;;  %2300 = vtanh.f32 %v372_v8  ;;  %v404_v8 = vld [vmem:[%s3079_s30 + $0x850] sm:$0xff] }
 0x124   : > { %v2283_v15 = vpop.eup %2282  ;;  %1386 = vst [vmem:[%s3101_s17 + $0x700] sm:$0xff] %v2281_v13  ;;  %2302 = vtanh.f32 %v373_v10  ;;  %v405_v10 = vld [vmem:[%s3079_s30 + $0x858] sm:$0xff] }
 0x125   : > { %v2285_v17 = vpop.eup %2284  ;;  %1387 = vst [vmem:[%s3101_s17 + $0x708] sm:$0xff] %v2283_v15  ;;  %2304 = vtanh.f32 %v374_v12  ;;  %v406_v12 = vld [vmem:[%s3079_s30 + $0x860] sm:$0xff] }
 0x126   : > { %v2287_v19 = vpop.eup %2286  ;;  %1388 = vst [vmem:[%s3101_s17 + $0x710] sm:$0xff] %v2285_v17  ;;  %2306 = vtanh.f32 %v375_v14  ;;  %v407_v14 = vld [vmem:[%s3079_s30 + $0x868] sm:$0xff] }
 0x127   : > { %v2289_v21 = vpop.eup %2288  ;;  %1389 = vst [vmem:[%s3101_s17 + $0x718] sm:$0xff] %v2287_v19  ;;  %2308 = vtanh.f32 %v376_v16  ;;  %v408_v16 = vld [vmem:[%s3079_s30 + $0x870] sm:$0xff] }
 0x128   : > { %v2291_v23 = vpop.eup %2290  ;;  %1390 = vst [vmem:[%s3101_s17 + $0x720] sm:$0xff] %v2289_v21  ;;  %2310 = vtanh.f32 %v377_v18  ;;  %v409_v18 = vld [vmem:[%s3079_s30 + $0x878] sm:$0xff] }
 0x129   : > { %v2293_v25 = vpop.eup %2292  ;;  %1391 = vst [vmem:[%s3101_s17 + $0x728] sm:$0xff] %v2291_v23  ;;  %2312 = vtanh.f32 %v378_v20  ;;  %v410_v20 = vld [vmem:[%s3079_s30 + $0x880] sm:$0xff] }
 0x12a   : > { %v2295_v27 = vpop.eup %2294  ;;  %1392 = vst [vmem:[%s3101_s17 + $0x730] sm:$0xff] %v2293_v25  ;;  %2314 = vtanh.f32 %v379_v22  ;;  %v411_v22 = vld [vmem:[%s3079_s30 + $0x888] sm:$0xff] }
 0x12b   : > { %v2297_v29 = vpop.eup %2296  ;;  %1393 = vst [vmem:[%s3101_s17 + $0x738] sm:$0xff] %v2295_v27  ;;  %2316 = vtanh.f32 %v380_v24  ;;  %v412_v24 = vld [vmem:[%s3079_s30 + $0x890] sm:$0xff] }
 0x12c   : > { %v2299_v31 = vpop.eup %2298  ;;  %1394 = vst [vmem:[%s3101_s17 + $0x740] sm:$0xff] %v2297_v29  ;;  %2318 = vtanh.f32 %v381_v26  ;;  %v413_v26 = vld [vmem:[%s3079_s30 + $0x898] sm:$0xff] }
 0x12d   : > { %v2301_v33 = vpop.eup %2300  ;;  %1395 = vst [vmem:[%s3101_s17 + $0x748] sm:$0xff] %v2299_v31  ;;  %2320 = vtanh.f32 %v382_v28  ;;  %v414_v28 = vld [vmem:[%s3079_s30 + $0x8a0] sm:$0xff] }
 0x12e   : > { %v2303_v35 = vpop.eup %2302  ;;  %1396 = vst [vmem:[%s3101_s17 + $0x750] sm:$0xff] %v2301_v33  ;;  %2322 = vtanh.f32 %v383_v30  ;;  %v415_v30 = vld [vmem:[%s3079_s30 + $0x8a8] sm:$0xff] }
 0x12f   : > { %v2305_v37 = vpop.eup %2304  ;;  %1397 = vst [vmem:[%s3101_s17 + $0x758] sm:$0xff] %v2303_v35  ;;  %2324 = vtanh.f32 %v384_v32  ;;  %v416_v32 = vld [vmem:[%s3079_s30 + $0x8b0] sm:$0xff] }
 0x130   : > { %v2307_v39 = vpop.eup %2306  ;;  %1398 = vst [vmem:[%s3101_s17 + $0x760] sm:$0xff] %v2305_v37  ;;  %2326 = vtanh.f32 %v385_v34  ;;  %v417_v34 = vld [vmem:[%s3079_s30 + $0x8b8] sm:$0xff] }
 0x131   : > { %v2309_v41 = vpop.eup %2308  ;;  %1399 = vst [vmem:[%s3101_s17 + $0x768] sm:$0xff] %v2307_v39  ;;  %2328 = vtanh.f32 %v386_v36  ;;  %v418_v36 = vld [vmem:[%s3079_s30 + $0x8c0] sm:$0xff] }
 0x132   : > { %v2311_v43 = vpop.eup %2310  ;;  %1400 = vst [vmem:[%s3101_s17 + $0x770] sm:$0xff] %v2309_v41  ;;  %2330 = vtanh.f32 %v387_v38  ;;  %v419_v38 = vld [vmem:[%s3079_s30 + $0x8c8] sm:$0xff] }
 0x133   : > { %v2313_v45 = vpop.eup %2312  ;;  %1401 = vst [vmem:[%s3101_s17 + $0x778] sm:$0xff] %v2311_v43  ;;  %2332 = vtanh.f32 %v388_v40  ;;  %v420_v40 = vld [vmem:[%s3079_s30 + $0x8d0] sm:$0xff] }
 0x134   : > { %v2315_v47 = vpop.eup %2314  ;;  %1402 = vst [vmem:[%s3101_s17 + $0x780] sm:$0xff] %v2313_v45  ;;  %2334 = vtanh.f32 %v389_v42  ;;  %v421_v42 = vld [vmem:[%s3079_s30 + $0x8d8] sm:$0xff] }
 0x135   : > { %v2317_v49 = vpop.eup %2316  ;;  %1403 = vst [vmem:[%s3101_s17 + $0x788] sm:$0xff] %v2315_v47  ;;  %2336 = vtanh.f32 %v390_v44  ;;  %v422_v44 = vld [vmem:[%s3079_s30 + $0x8e0] sm:$0xff] }
 0x136   : > { %v2319_v51 = vpop.eup %2318  ;;  %1404 = vst [vmem:[%s3101_s17 + $0x790] sm:$0xff] %v2317_v49  ;;  %2338 = vtanh.f32 %v391_v46  ;;  %v423_v46 = vld [vmem:[%s3079_s30 + $0x8e8] sm:$0xff] }
 0x137   : > { %v2321_v53 = vpop.eup %2320  ;;  %1405 = vst [vmem:[%s3101_s17 + $0x798] sm:$0xff] %v2319_v51  ;;  %2340 = vtanh.f32 %v392_v48  ;;  %v424_v48 = vld [vmem:[%s3079_s30 + $0x8f0] sm:$0xff] }
 0x138   : > { %v2323_v55 = vpop.eup %2322  ;;  %1406 = vst [vmem:[%s3101_s17 + $0x7a0] sm:$0xff] %v2321_v53  ;;  %2342 = vtanh.f32 %v393_v50  ;;  %v425_v50 = vld [vmem:[%s3079_s30 + $0x8f8] sm:$0xff] }
 0x139   : > { %v2325_v57 = vpop.eup %2324  ;;  %1407 = vst [vmem:[%s3101_s17 + $0x7a8] sm:$0xff] %v2323_v55  ;;  %2344 = vtanh.f32 %v394_v52  ;;  %v426_v52 = vld [vmem:[%s3079_s30 + $0x900] sm:$0xff] }
 0x13a   : > { %v2327_v59 = vpop.eup %2326  ;;  %1408 = vst [vmem:[%s3101_s17 + $0x7b0] sm:$0xff] %v2325_v57  ;;  %2346 = vtanh.f32 %v395_v54  ;;  %v427_v54 = vld [vmem:[%s3079_s30 + $0x908] sm:$0xff] }
 0x13b   : > { %v2329_v61 = vpop.eup %2328  ;;  %1409 = vst [vmem:[%s3101_s17 + $0x7b8] sm:$0xff] %v2327_v59  ;;  %2348 = vtanh.f32 %v396_v56  ;;  %v428_v56 = vld [vmem:[%s3079_s30 + $0x910] sm:$0xff] }
 0x13c   : > { %v2331_v63 = vpop.eup %2330  ;;  %1410 = vst [vmem:[%s3101_s17 + $0x7c0] sm:$0xff] %v2329_v61  ;;  %2350 = vtanh.f32 %v397_v58  ;;  %v429_v58 = vld [vmem:[%s3079_s30 + $0x918] sm:$0xff] }
 0x13d   : > { %v2333_v1 = vpop.eup %2332  ;;  %1411 = vst [vmem:[%s3101_s17 + $0x7c8] sm:$0xff] %v2331_v63  ;;  %2352 = vtanh.f32 %v398_v60  ;;  %v430_v60 = vld [vmem:[%s3079_s30 + $0x920] sm:$0xff] }
 0x13e   : > { %v2335_v3 = vpop.eup %2334  ;;  %1412 = vst [vmem:[%s3101_s17 + $0x7d0] sm:$0xff] %v2333_v1  ;;  %2354 = vtanh.f32 %v399_v62  ;;  %v431_v62 = vld [vmem:[%s3079_s30 + $0x928] sm:$0xff] }
 0x13f   : > { %v2337_v5 = vpop.eup %2336  ;;  %1413 = vst [vmem:[%s3101_s17 + $0x7d8] sm:$0xff] %v2335_v3  ;;  %2356 = vtanh.f32 %v400_v0  ;;  %v432_v0 = vld [vmem:[%s3079_s30 + $0x930] sm:$0xff] }
 0x140   : > { %v2339_v7 = vpop.eup %2338  ;;  %1414 = vst [vmem:[%s3101_s17 + $0x7e0] sm:$0xff] %v2337_v5  ;;  %2358 = vtanh.f32 %v401_v2  ;;  %v433_v2 = vld [vmem:[%s3079_s30 + $0x938] sm:$0xff] }
 0x141   : > { %v2341_v9 = vpop.eup %2340  ;;  %1415 = vst [vmem:[%s3101_s17 + $0x7e8] sm:$0xff] %v2339_v7  ;;  %2360 = vtanh.f32 %v402_v4  ;;  %v434_v4 = vld [vmem:[%s3079_s30 + $0x940] sm:$0xff] }
 0x142   : > { %v2343_v11 = vpop.eup %2342  ;;  %1416 = vst [vmem:[%s3101_s17 + $0x7f0] sm:$0xff] %v2341_v9  ;;  %2362 = vtanh.f32 %v403_v6  ;;  %v435_v6 = vld [vmem:[%s3079_s30 + $0x948] sm:$0xff] }
 0x143   : > { %v2345_v13 = vpop.eup %2344  ;;  %1417 = vst [vmem:[%s3101_s17 + $0x7f8] sm:$0xff] %v2343_v11  ;;  %2364 = vtanh.f32 %v404_v8  ;;  %v436_v8 = vld [vmem:[%s3079_s30 + $0x950] sm:$0xff] }
 0x144   : > { %v2347_v15 = vpop.eup %2346  ;;  %1418 = vst [vmem:[%s3101_s17 + $0x800] sm:$0xff] %v2345_v13  ;;  %2366 = vtanh.f32 %v405_v10  ;;  %v437_v10 = vld [vmem:[%s3079_s30 + $0x958] sm:$0xff] }
 0x145   : > { %v2349_v17 = vpop.eup %2348  ;;  %1419 = vst [vmem:[%s3101_s17 + $0x808] sm:$0xff] %v2347_v15  ;;  %2368 = vtanh.f32 %v406_v12  ;;  %v438_v12 = vld [vmem:[%s3079_s30 + $0x960] sm:$0xff] }
 0x146   : > { %v2351_v19 = vpop.eup %2350  ;;  %1420 = vst [vmem:[%s3101_s17 + $0x810] sm:$0xff] %v2349_v17  ;;  %2370 = vtanh.f32 %v407_v14  ;;  %v439_v14 = vld [vmem:[%s3079_s30 + $0x968] sm:$0xff] }
 0x147   : > { %v2353_v21 = vpop.eup %2352  ;;  %1421 = vst [vmem:[%s3101_s17 + $0x818] sm:$0xff] %v2351_v19  ;;  %2372 = vtanh.f32 %v408_v16  ;;  %v440_v16 = vld [vmem:[%s3079_s30 + $0x970] sm:$0xff] }
 0x148   : > { %v2355_v23 = vpop.eup %2354  ;;  %1422 = vst [vmem:[%s3101_s17 + $0x820] sm:$0xff] %v2353_v21  ;;  %2374 = vtanh.f32 %v409_v18  ;;  %v441_v18 = vld [vmem:[%s3079_s30 + $0x978] sm:$0xff] }
 0x149   : > { %v2357_v25 = vpop.eup %2356  ;;  %1423 = vst [vmem:[%s3101_s17 + $0x828] sm:$0xff] %v2355_v23  ;;  %2376 = vtanh.f32 %v410_v20  ;;  %v442_v20 = vld [vmem:[%s3079_s30 + $0x980] sm:$0xff] }
 0x14a   : > { %v2359_v27 = vpop.eup %2358  ;;  %1424 = vst [vmem:[%s3101_s17 + $0x830] sm:$0xff] %v2357_v25  ;;  %2378 = vtanh.f32 %v411_v22  ;;  %v443_v22 = vld [vmem:[%s3079_s30 + $0x988] sm:$0xff] }
 0x14b   : > { %v2361_v29 = vpop.eup %2360  ;;  %1425 = vst [vmem:[%s3101_s17 + $0x838] sm:$0xff] %v2359_v27  ;;  %2380 = vtanh.f32 %v412_v24  ;;  %v444_v24 = vld [vmem:[%s3079_s30 + $0x990] sm:$0xff] }
 0x14c   : > { %v2363_v31 = vpop.eup %2362  ;;  %1426 = vst [vmem:[%s3101_s17 + $0x840] sm:$0xff] %v2361_v29  ;;  %2382 = vtanh.f32 %v413_v26  ;;  %v445_v26 = vld [vmem:[%s3079_s30 + $0x998] sm:$0xff] }
 0x14d   : > { %v2365_v33 = vpop.eup %2364  ;;  %1427 = vst [vmem:[%s3101_s17 + $0x848] sm:$0xff] %v2363_v31  ;;  %2384 = vtanh.f32 %v414_v28  ;;  %v446_v28 = vld [vmem:[%s3079_s30 + $0x9a0] sm:$0xff] }
 0x14e   : > { %v2367_v35 = vpop.eup %2366  ;;  %1428 = vst [vmem:[%s3101_s17 + $0x850] sm:$0xff] %v2365_v33  ;;  %2386 = vtanh.f32 %v415_v30  ;;  %v447_v30 = vld [vmem:[%s3079_s30 + $0x9a8] sm:$0xff] }
 0x14f   : > { %v2369_v37 = vpop.eup %2368  ;;  %1429 = vst [vmem:[%s3101_s17 + $0x858] sm:$0xff] %v2367_v35  ;;  %2388 = vtanh.f32 %v416_v32  ;;  %v448_v32 = vld [vmem:[%s3079_s30 + $0x9b0] sm:$0xff] }
 0x150   : > { %v2371_v39 = vpop.eup %2370  ;;  %1430 = vst [vmem:[%s3101_s17 + $0x860] sm:$0xff] %v2369_v37  ;;  %2390 = vtanh.f32 %v417_v34  ;;  %v449_v34 = vld [vmem:[%s3079_s30 + $0x9b8] sm:$0xff] }
 0x151   : > { %v2373_v41 = vpop.eup %2372  ;;  %1431 = vst [vmem:[%s3101_s17 + $0x868] sm:$0xff] %v2371_v39  ;;  %2392 = vtanh.f32 %v418_v36  ;;  %v450_v36 = vld [vmem:[%s3079_s30 + $0x9c0] sm:$0xff] }
 0x152   : > { %v2375_v43 = vpop.eup %2374  ;;  %1432 = vst [vmem:[%s3101_s17 + $0x870] sm:$0xff] %v2373_v41  ;;  %2394 = vtanh.f32 %v419_v38  ;;  %v451_v38 = vld [vmem:[%s3079_s30 + $0x9c8] sm:$0xff] }
 0x153   : > { %v2377_v45 = vpop.eup %2376  ;;  %1433 = vst [vmem:[%s3101_s17 + $0x878] sm:$0xff] %v2375_v43  ;;  %2396 = vtanh.f32 %v420_v40  ;;  %v452_v40 = vld [vmem:[%s3079_s30 + $0x9d0] sm:$0xff] }
 0x154   : > { %v2379_v47 = vpop.eup %2378  ;;  %1434 = vst [vmem:[%s3101_s17 + $0x880] sm:$0xff] %v2377_v45  ;;  %2398 = vtanh.f32 %v421_v42  ;;  %v453_v42 = vld [vmem:[%s3079_s30 + $0x9d8] sm:$0xff] }
 0x155   : > { %v2381_v49 = vpop.eup %2380  ;;  %1435 = vst [vmem:[%s3101_s17 + $0x888] sm:$0xff] %v2379_v47  ;;  %2400 = vtanh.f32 %v422_v44  ;;  %v454_v44 = vld [vmem:[%s3079_s30 + $0x9e0] sm:$0xff] }
 0x156   : > { %v2383_v51 = vpop.eup %2382  ;;  %1436 = vst [vmem:[%s3101_s17 + $0x890] sm:$0xff] %v2381_v49  ;;  %2402 = vtanh.f32 %v423_v46  ;;  %v455_v46 = vld [vmem:[%s3079_s30 + $0x9e8] sm:$0xff] }
 0x157   : > { %v2385_v53 = vpop.eup %2384  ;;  %1437 = vst [vmem:[%s3101_s17 + $0x898] sm:$0xff] %v2383_v51  ;;  %2404 = vtanh.f32 %v424_v48  ;;  %v456_v48 = vld [vmem:[%s3079_s30 + $0x9f0] sm:$0xff] }
 0x158   : > { %v2387_v55 = vpop.eup %2386  ;;  %1438 = vst [vmem:[%s3101_s17 + $0x8a0] sm:$0xff] %v2385_v53  ;;  %2406 = vtanh.f32 %v425_v50  ;;  %v457_v50 = vld [vmem:[%s3079_s30 + $0x9f8] sm:$0xff] }
 0x159   : > { %v2389_v57 = vpop.eup %2388  ;;  %1439 = vst [vmem:[%s3101_s17 + $0x8a8] sm:$0xff] %v2387_v55  ;;  %2408 = vtanh.f32 %v426_v52  ;;  %v458_v52 = vld [vmem:[%s3079_s30 + $0xa00] sm:$0xff] }
 0x15a   : > { %v2391_v59 = vpop.eup %2390  ;;  %1440 = vst [vmem:[%s3101_s17 + $0x8b0] sm:$0xff] %v2389_v57  ;;  %2410 = vtanh.f32 %v427_v54  ;;  %v459_v54 = vld [vmem:[%s3079_s30 + $0xa08] sm:$0xff] }
 0x15b   : > { %v2393_v61 = vpop.eup %2392  ;;  %1441 = vst [vmem:[%s3101_s17 + $0x8b8] sm:$0xff] %v2391_v59  ;;  %2412 = vtanh.f32 %v428_v56  ;;  %v460_v56 = vld [vmem:[%s3079_s30 + $0xa10] sm:$0xff] }
 0x15c   : > { %v2395_v63 = vpop.eup %2394  ;;  %1442 = vst [vmem:[%s3101_s17 + $0x8c0] sm:$0xff] %v2393_v61  ;;  %2414 = vtanh.f32 %v429_v58  ;;  %v461_v58 = vld [vmem:[%s3079_s30 + $0xa18] sm:$0xff] }
 0x15d   : > { %v2397_v1 = vpop.eup %2396  ;;  %1443 = vst [vmem:[%s3101_s17 + $0x8c8] sm:$0xff] %v2395_v63  ;;  %2416 = vtanh.f32 %v430_v60  ;;  %v462_v60 = vld [vmem:[%s3079_s30 + $0xa20] sm:$0xff] }
 0x15e   : > { %v2399_v3 = vpop.eup %2398  ;;  %1444 = vst [vmem:[%s3101_s17 + $0x8d0] sm:$0xff] %v2397_v1  ;;  %2418 = vtanh.f32 %v431_v62  ;;  %v463_v62 = vld [vmem:[%s3079_s30 + $0xa28] sm:$0xff] }
 0x15f   : > { %v2401_v5 = vpop.eup %2400  ;;  %1445 = vst [vmem:[%s3101_s17 + $0x8d8] sm:$0xff] %v2399_v3  ;;  %2420 = vtanh.f32 %v432_v0  ;;  %v464_v0 = vld [vmem:[%s3079_s30 + $0xa30] sm:$0xff] }
 0x160   : > { %v2403_v7 = vpop.eup %2402  ;;  %1446 = vst [vmem:[%s3101_s17 + $0x8e0] sm:$0xff] %v2401_v5  ;;  %2422 = vtanh.f32 %v433_v2  ;;  %v465_v2 = vld [vmem:[%s3079_s30 + $0xa38] sm:$0xff] }
 0x161   : > { %v2405_v9 = vpop.eup %2404  ;;  %1447 = vst [vmem:[%s3101_s17 + $0x8e8] sm:$0xff] %v2403_v7  ;;  %2424 = vtanh.f32 %v434_v4  ;;  %v466_v4 = vld [vmem:[%s3079_s30 + $0xa40] sm:$0xff] }
 0x162   : > { %v2407_v11 = vpop.eup %2406  ;;  %1448 = vst [vmem:[%s3101_s17 + $0x8f0] sm:$0xff] %v2405_v9  ;;  %2426 = vtanh.f32 %v435_v6  ;;  %v467_v6 = vld [vmem:[%s3079_s30 + $0xa48] sm:$0xff] }
 0x163   : > { %v2409_v13 = vpop.eup %2408  ;;  %1449 = vst [vmem:[%s3101_s17 + $0x8f8] sm:$0xff] %v2407_v11  ;;  %2428 = vtanh.f32 %v436_v8  ;;  %v468_v8 = vld [vmem:[%s3079_s30 + $0xa50] sm:$0xff] }
 0x164   : > { %v2411_v15 = vpop.eup %2410  ;;  %1450 = vst [vmem:[%s3101_s17 + $0x900] sm:$0xff] %v2409_v13  ;;  %2430 = vtanh.f32 %v437_v10  ;;  %v469_v10 = vld [vmem:[%s3079_s30 + $0xa58] sm:$0xff] }
 0x165   : > { %v2413_v17 = vpop.eup %2412  ;;  %1451 = vst [vmem:[%s3101_s17 + $0x908] sm:$0xff] %v2411_v15  ;;  %2432 = vtanh.f32 %v438_v12  ;;  %v470_v12 = vld [vmem:[%s3079_s30 + $0xa60] sm:$0xff] }
 0x166   : > { %v2415_v19 = vpop.eup %2414  ;;  %1452 = vst [vmem:[%s3101_s17 + $0x910] sm:$0xff] %v2413_v17  ;;  %2434 = vtanh.f32 %v439_v14  ;;  %v471_v14 = vld [vmem:[%s3079_s30 + $0xa68] sm:$0xff] }
 0x167   : > { %v2417_v21 = vpop.eup %2416  ;;  %1453 = vst [vmem:[%s3101_s17 + $0x918] sm:$0xff] %v2415_v19  ;;  %2436 = vtanh.f32 %v440_v16  ;;  %v472_v16 = vld [vmem:[%s3079_s30 + $0xa70] sm:$0xff] }
 0x168   : > { %v2419_v23 = vpop.eup %2418  ;;  %1454 = vst [vmem:[%s3101_s17 + $0x920] sm:$0xff] %v2417_v21  ;;  %2438 = vtanh.f32 %v441_v18  ;;  %v473_v18 = vld [vmem:[%s3079_s30 + $0xa78] sm:$0xff] }
 0x169   : > { %v2421_v25 = vpop.eup %2420  ;;  %1455 = vst [vmem:[%s3101_s17 + $0x928] sm:$0xff] %v2419_v23  ;;  %2440 = vtanh.f32 %v442_v20  ;;  %v474_v20 = vld [vmem:[%s3079_s30 + $0xa80] sm:$0xff] }
 0x16a   : > { %v2423_v27 = vpop.eup %2422  ;;  %1456 = vst [vmem:[%s3101_s17 + $0x930] sm:$0xff] %v2421_v25  ;;  %2442 = vtanh.f32 %v443_v22  ;;  %v475_v22 = vld [vmem:[%s3079_s30 + $0xa88] sm:$0xff] }
 0x16b   : > { %v2425_v29 = vpop.eup %2424  ;;  %1457 = vst [vmem:[%s3101_s17 + $0x938] sm:$0xff] %v2423_v27  ;;  %2444 = vtanh.f32 %v444_v24  ;;  %v476_v24 = vld [vmem:[%s3079_s30 + $0xa90] sm:$0xff] }
 0x16c   : > { %v2427_v31 = vpop.eup %2426  ;;  %1458 = vst [vmem:[%s3101_s17 + $0x940] sm:$0xff] %v2425_v29  ;;  %2446 = vtanh.f32 %v445_v26  ;;  %v477_v26 = vld [vmem:[%s3079_s30 + $0xa98] sm:$0xff] }
 0x16d   : > { %v2429_v33 = vpop.eup %2428  ;;  %1459 = vst [vmem:[%s3101_s17 + $0x948] sm:$0xff] %v2427_v31  ;;  %2448 = vtanh.f32 %v446_v28  ;;  %v478_v28 = vld [vmem:[%s3079_s30 + $0xaa0] sm:$0xff] }
 0x16e   : > { %v2431_v35 = vpop.eup %2430  ;;  %1460 = vst [vmem:[%s3101_s17 + $0x950] sm:$0xff] %v2429_v33  ;;  %2450 = vtanh.f32 %v447_v30  ;;  %v479_v30 = vld [vmem:[%s3079_s30 + $0xaa8] sm:$0xff] }
 0x16f   : > { %v2433_v37 = vpop.eup %2432  ;;  %1461 = vst [vmem:[%s3101_s17 + $0x958] sm:$0xff] %v2431_v35  ;;  %2452 = vtanh.f32 %v448_v32  ;;  %v480_v32 = vld [vmem:[%s3079_s30 + $0xab0] sm:$0xff] }
 0x170   : > { %v2435_v39 = vpop.eup %2434  ;;  %1462 = vst [vmem:[%s3101_s17 + $0x960] sm:$0xff] %v2433_v37  ;;  %2454 = vtanh.f32 %v449_v34  ;;  %v481_v34 = vld [vmem:[%s3079_s30 + $0xab8] sm:$0xff] }
 0x171   : > { %v2437_v41 = vpop.eup %2436  ;;  %1463 = vst [vmem:[%s3101_s17 + $0x968] sm:$0xff] %v2435_v39  ;;  %2456 = vtanh.f32 %v450_v36  ;;  %v482_v36 = vld [vmem:[%s3079_s30 + $0xac0] sm:$0xff] }
 0x172   : > { %v2439_v43 = vpop.eup %2438  ;;  %1464 = vst [vmem:[%s3101_s17 + $0x970] sm:$0xff] %v2437_v41  ;;  %2458 = vtanh.f32 %v451_v38  ;;  %v483_v38 = vld [vmem:[%s3079_s30 + $0xac8] sm:$0xff] }
 0x173   : > { %v2441_v45 = vpop.eup %2440  ;;  %1465 = vst [vmem:[%s3101_s17 + $0x978] sm:$0xff] %v2439_v43  ;;  %2460 = vtanh.f32 %v452_v40  ;;  %v484_v40 = vld [vmem:[%s3079_s30 + $0xad0] sm:$0xff] }
 0x174   : > { %v2443_v47 = vpop.eup %2442  ;;  %1466 = vst [vmem:[%s3101_s17 + $0x980] sm:$0xff] %v2441_v45  ;;  %2462 = vtanh.f32 %v453_v42  ;;  %v485_v42 = vld [vmem:[%s3079_s30 + $0xad8] sm:$0xff] }
 0x175   : > { %v2445_v49 = vpop.eup %2444  ;;  %1467 = vst [vmem:[%s3101_s17 + $0x988] sm:$0xff] %v2443_v47  ;;  %2464 = vtanh.f32 %v454_v44  ;;  %v486_v44 = vld [vmem:[%s3079_s30 + $0xae0] sm:$0xff] }
 0x176   : > { %v2447_v51 = vpop.eup %2446  ;;  %1468 = vst [vmem:[%s3101_s17 + $0x990] sm:$0xff] %v2445_v49  ;;  %2466 = vtanh.f32 %v455_v46  ;;  %v487_v46 = vld [vmem:[%s3079_s30 + $0xae8] sm:$0xff] }
 0x177   : > { %v2449_v53 = vpop.eup %2448  ;;  %1469 = vst [vmem:[%s3101_s17 + $0x998] sm:$0xff] %v2447_v51  ;;  %2468 = vtanh.f32 %v456_v48  ;;  %v488_v48 = vld [vmem:[%s3079_s30 + $0xaf0] sm:$0xff] }
 0x178   : > { %v2451_v55 = vpop.eup %2450  ;;  %1470 = vst [vmem:[%s3101_s17 + $0x9a0] sm:$0xff] %v2449_v53  ;;  %2470 = vtanh.f32 %v457_v50  ;;  %v489_v50 = vld [vmem:[%s3079_s30 + $0xaf8] sm:$0xff] }
 0x179   : > { %v2453_v57 = vpop.eup %2452  ;;  %1471 = vst [vmem:[%s3101_s17 + $0x9a8] sm:$0xff] %v2451_v55  ;;  %2472 = vtanh.f32 %v458_v52  ;;  %v490_v52 = vld [vmem:[%s3079_s30 + $0xb00] sm:$0xff] }
 0x17a   : > { %v2455_v59 = vpop.eup %2454  ;;  %1472 = vst [vmem:[%s3101_s17 + $0x9b0] sm:$0xff] %v2453_v57  ;;  %2474 = vtanh.f32 %v459_v54  ;;  %v491_v54 = vld [vmem:[%s3079_s30 + $0xb08] sm:$0xff] }
 0x17b   : > { %v2457_v61 = vpop.eup %2456  ;;  %1473 = vst [vmem:[%s3101_s17 + $0x9b8] sm:$0xff] %v2455_v59  ;;  %2476 = vtanh.f32 %v460_v56  ;;  %v492_v56 = vld [vmem:[%s3079_s30 + $0xb10] sm:$0xff] }
 0x17c   : > { %v2459_v63 = vpop.eup %2458  ;;  %1474 = vst [vmem:[%s3101_s17 + $0x9c0] sm:$0xff] %v2457_v61  ;;  %2478 = vtanh.f32 %v461_v58  ;;  %v493_v58 = vld [vmem:[%s3079_s30 + $0xb18] sm:$0xff] }
 0x17d   : > { %v2461_v1 = vpop.eup %2460  ;;  %1475 = vst [vmem:[%s3101_s17 + $0x9c8] sm:$0xff] %v2459_v63  ;;  %2480 = vtanh.f32 %v462_v60  ;;  %v494_v60 = vld [vmem:[%s3079_s30 + $0xb20] sm:$0xff] }
 0x17e   : > { %v2463_v3 = vpop.eup %2462  ;;  %1476 = vst [vmem:[%s3101_s17 + $0x9d0] sm:$0xff] %v2461_v1  ;;  %2482 = vtanh.f32 %v463_v62  ;;  %v495_v62 = vld [vmem:[%s3079_s30 + $0xb28] sm:$0xff] }
 0x17f   : > { %v2465_v5 = vpop.eup %2464  ;;  %1477 = vst [vmem:[%s3101_s17 + $0x9d8] sm:$0xff] %v2463_v3  ;;  %2484 = vtanh.f32 %v464_v0  ;;  %v496_v0 = vld [vmem:[%s3079_s30 + $0xb30] sm:$0xff] }
 0x180   : > { %v2467_v7 = vpop.eup %2466  ;;  %1478 = vst [vmem:[%s3101_s17 + $0x9e0] sm:$0xff] %v2465_v5  ;;  %2486 = vtanh.f32 %v465_v2  ;;  %v497_v2 = vld [vmem:[%s3079_s30 + $0xb38] sm:$0xff] }
 0x181   : > { %v2469_v9 = vpop.eup %2468  ;;  %1479 = vst [vmem:[%s3101_s17 + $0x9e8] sm:$0xff] %v2467_v7  ;;  %2488 = vtanh.f32 %v466_v4  ;;  %v498_v4 = vld [vmem:[%s3079_s30 + $0xb40] sm:$0xff] }
 0x182   : > { %v2471_v11 = vpop.eup %2470  ;;  %1480 = vst [vmem:[%s3101_s17 + $0x9f0] sm:$0xff] %v2469_v9  ;;  %2490 = vtanh.f32 %v467_v6  ;;  %v499_v6 = vld [vmem:[%s3079_s30 + $0xb48] sm:$0xff] }
 0x183   : > { %v2473_v13 = vpop.eup %2472  ;;  %1481 = vst [vmem:[%s3101_s17 + $0x9f8] sm:$0xff] %v2471_v11  ;;  %2492 = vtanh.f32 %v468_v8  ;;  %v500_v8 = vld [vmem:[%s3079_s30 + $0xb50] sm:$0xff] }
 0x184   : > { %v2475_v15 = vpop.eup %2474  ;;  %1482 = vst [vmem:[%s3101_s17 + $0xa00] sm:$0xff] %v2473_v13  ;;  %2494 = vtanh.f32 %v469_v10  ;;  %v501_v10 = vld [vmem:[%s3079_s30 + $0xb58] sm:$0xff] }
 0x185   : > { %v2477_v17 = vpop.eup %2476  ;;  %1483 = vst [vmem:[%s3101_s17 + $0xa08] sm:$0xff] %v2475_v15  ;;  %2496 = vtanh.f32 %v470_v12  ;;  %v502_v12 = vld [vmem:[%s3079_s30 + $0xb60] sm:$0xff] }
 0x186   : > { %v2479_v19 = vpop.eup %2478  ;;  %1484 = vst [vmem:[%s3101_s17 + $0xa10] sm:$0xff] %v2477_v17  ;;  %2498 = vtanh.f32 %v471_v14  ;;  %v503_v14 = vld [vmem:[%s3079_s30 + $0xb68] sm:$0xff] }
 0x187   : > { %v2481_v21 = vpop.eup %2480  ;;  %1485 = vst [vmem:[%s3101_s17 + $0xa18] sm:$0xff] %v2479_v19  ;;  %2500 = vtanh.f32 %v472_v16  ;;  %v504_v16 = vld [vmem:[%s3079_s30 + $0xb70] sm:$0xff] }
 0x188   : > { %v2483_v23 = vpop.eup %2482  ;;  %1486 = vst [vmem:[%s3101_s17 + $0xa20] sm:$0xff] %v2481_v21  ;;  %2502 = vtanh.f32 %v473_v18  ;;  %v505_v18 = vld [vmem:[%s3079_s30 + $0xb78] sm:$0xff] }
 0x189   : > { %v2485_v25 = vpop.eup %2484  ;;  %1487 = vst [vmem:[%s3101_s17 + $0xa28] sm:$0xff] %v2483_v23  ;;  %2504 = vtanh.f32 %v474_v20  ;;  %v506_v20 = vld [vmem:[%s3079_s30 + $0xb80] sm:$0xff] }
 0x18a   : > { %v2487_v27 = vpop.eup %2486  ;;  %1488 = vst [vmem:[%s3101_s17 + $0xa30] sm:$0xff] %v2485_v25  ;;  %2506 = vtanh.f32 %v475_v22  ;;  %v507_v22 = vld [vmem:[%s3079_s30 + $0xb88] sm:$0xff] }
 0x18b   : > { %v2489_v29 = vpop.eup %2488  ;;  %1489 = vst [vmem:[%s3101_s17 + $0xa38] sm:$0xff] %v2487_v27  ;;  %2508 = vtanh.f32 %v476_v24  ;;  %v508_v24 = vld [vmem:[%s3079_s30 + $0xb90] sm:$0xff] }
 0x18c   : > { %v2491_v31 = vpop.eup %2490  ;;  %1490 = vst [vmem:[%s3101_s17 + $0xa40] sm:$0xff] %v2489_v29  ;;  %2510 = vtanh.f32 %v477_v26  ;;  %v509_v26 = vld [vmem:[%s3079_s30 + $0xb98] sm:$0xff] }
 0x18d   : > { %v2493_v33 = vpop.eup %2492  ;;  %1491 = vst [vmem:[%s3101_s17 + $0xa48] sm:$0xff] %v2491_v31  ;;  %2512 = vtanh.f32 %v478_v28  ;;  %v510_v28 = vld [vmem:[%s3079_s30 + $0xba0] sm:$0xff] }
 0x18e   : > { %v2495_v35 = vpop.eup %2494  ;;  %1492 = vst [vmem:[%s3101_s17 + $0xa50] sm:$0xff] %v2493_v33  ;;  %2514 = vtanh.f32 %v479_v30  ;;  %v511_v30 = vld [vmem:[%s3079_s30 + $0xba8] sm:$0xff] }
 0x18f   : > { %v2497_v37 = vpop.eup %2496  ;;  %1493 = vst [vmem:[%s3101_s17 + $0xa58] sm:$0xff] %v2495_v35  ;;  %2516 = vtanh.f32 %v480_v32  ;;  %v512_v32 = vld [vmem:[%s3079_s30 + $0xbb0] sm:$0xff] }
 0x190   : > { %v2499_v39 = vpop.eup %2498  ;;  %1494 = vst [vmem:[%s3101_s17 + $0xa60] sm:$0xff] %v2497_v37  ;;  %2518 = vtanh.f32 %v481_v34  ;;  %v513_v34 = vld [vmem:[%s3079_s30 + $0xbb8] sm:$0xff] }
 0x191   : > { %v2501_v41 = vpop.eup %2500  ;;  %1495 = vst [vmem:[%s3101_s17 + $0xa68] sm:$0xff] %v2499_v39  ;;  %2520 = vtanh.f32 %v482_v36  ;;  %v514_v36 = vld [vmem:[%s3079_s30 + $0xbc0] sm:$0xff] }
 0x192   : > { %v2503_v43 = vpop.eup %2502  ;;  %1496 = vst [vmem:[%s3101_s17 + $0xa70] sm:$0xff] %v2501_v41  ;;  %2522 = vtanh.f32 %v483_v38  ;;  %v515_v38 = vld [vmem:[%s3079_s30 + $0xbc8] sm:$0xff] }
 0x193   : > { %v2505_v45 = vpop.eup %2504  ;;  %1497 = vst [vmem:[%s3101_s17 + $0xa78] sm:$0xff] %v2503_v43  ;;  %2524 = vtanh.f32 %v484_v40  ;;  %v516_v40 = vld [vmem:[%s3079_s30 + $0xbd0] sm:$0xff] }
 0x194   : > { %v2507_v47 = vpop.eup %2506  ;;  %1498 = vst [vmem:[%s3101_s17 + $0xa80] sm:$0xff] %v2505_v45  ;;  %2526 = vtanh.f32 %v485_v42  ;;  %v517_v42 = vld [vmem:[%s3079_s30 + $0xbd8] sm:$0xff] }
 0x195   : > { %v2509_v49 = vpop.eup %2508  ;;  %1499 = vst [vmem:[%s3101_s17 + $0xa88] sm:$0xff] %v2507_v47  ;;  %2528 = vtanh.f32 %v486_v44  ;;  %v518_v44 = vld [vmem:[%s3079_s30 + $0xbe0] sm:$0xff] }
 0x196   : > { %v2511_v51 = vpop.eup %2510  ;;  %1500 = vst [vmem:[%s3101_s17 + $0xa90] sm:$0xff] %v2509_v49  ;;  %2530 = vtanh.f32 %v487_v46  ;;  %v519_v46 = vld [vmem:[%s3079_s30 + $0xbe8] sm:$0xff] }
 0x197   : > { %v2513_v53 = vpop.eup %2512  ;;  %1501 = vst [vmem:[%s3101_s17 + $0xa98] sm:$0xff] %v2511_v51  ;;  %2532 = vtanh.f32 %v488_v48  ;;  %v520_v48 = vld [vmem:[%s3079_s30 + $0xbf0] sm:$0xff] }
 0x198   : > { %v2515_v55 = vpop.eup %2514  ;;  %1502 = vst [vmem:[%s3101_s17 + $0xaa0] sm:$0xff] %v2513_v53  ;;  %2534 = vtanh.f32 %v489_v50  ;;  %v521_v50 = vld [vmem:[%s3079_s30 + $0xbf8] sm:$0xff] }
 0x199   : > { %v2517_v57 = vpop.eup %2516  ;;  %1503 = vst [vmem:[%s3101_s17 + $0xaa8] sm:$0xff] %v2515_v55  ;;  %2536 = vtanh.f32 %v490_v52  ;;  %v522_v52 = vld [vmem:[%s3079_s30 + $0xc00] sm:$0xff] }
 0x19a   : > { %v2519_v59 = vpop.eup %2518  ;;  %1504 = vst [vmem:[%s3101_s17 + $0xab0] sm:$0xff] %v2517_v57  ;;  %2538 = vtanh.f32 %v491_v54  ;;  %v523_v54 = vld [vmem:[%s3079_s30 + $0xc08] sm:$0xff] }
 0x19b   : > { %v2521_v61 = vpop.eup %2520  ;;  %1505 = vst [vmem:[%s3101_s17 + $0xab8] sm:$0xff] %v2519_v59  ;;  %2540 = vtanh.f32 %v492_v56  ;;  %v524_v56 = vld [vmem:[%s3079_s30 + $0xc10] sm:$0xff] }
 0x19c   : > { %v2523_v63 = vpop.eup %2522  ;;  %1506 = vst [vmem:[%s3101_s17 + $0xac0] sm:$0xff] %v2521_v61  ;;  %2542 = vtanh.f32 %v493_v58  ;;  %v525_v58 = vld [vmem:[%s3079_s30 + $0xc18] sm:$0xff] }
 0x19d   : > { %v2525_v1 = vpop.eup %2524  ;;  %1507 = vst [vmem:[%s3101_s17 + $0xac8] sm:$0xff] %v2523_v63  ;;  %2544 = vtanh.f32 %v494_v60  ;;  %v526_v60 = vld [vmem:[%s3079_s30 + $0xc20] sm:$0xff] }
 0x19e   : > { %v2527_v3 = vpop.eup %2526  ;;  %1508 = vst [vmem:[%s3101_s17 + $0xad0] sm:$0xff] %v2525_v1  ;;  %2546 = vtanh.f32 %v495_v62  ;;  %v527_v62 = vld [vmem:[%s3079_s30 + $0xc28] sm:$0xff] }
 0x19f   : > { %v2529_v5 = vpop.eup %2528  ;;  %1509 = vst [vmem:[%s3101_s17 + $0xad8] sm:$0xff] %v2527_v3  ;;  %2548 = vtanh.f32 %v496_v0  ;;  %v528_v0 = vld [vmem:[%s3079_s30 + $0xc30] sm:$0xff] }
 0x1a0   : > { %v2531_v7 = vpop.eup %2530  ;;  %1510 = vst [vmem:[%s3101_s17 + $0xae0] sm:$0xff] %v2529_v5  ;;  %2550 = vtanh.f32 %v497_v2  ;;  %v529_v2 = vld [vmem:[%s3079_s30 + $0xc38] sm:$0xff] }
 0x1a1   : > { %v2533_v9 = vpop.eup %2532  ;;  %1511 = vst [vmem:[%s3101_s17 + $0xae8] sm:$0xff] %v2531_v7  ;;  %2552 = vtanh.f32 %v498_v4  ;;  %v530_v4 = vld [vmem:[%s3079_s30 + $0xc40] sm:$0xff] }
 0x1a2   : > { %v2535_v11 = vpop.eup %2534  ;;  %1512 = vst [vmem:[%s3101_s17 + $0xaf0] sm:$0xff] %v2533_v9  ;;  %2554 = vtanh.f32 %v499_v6  ;;  %v531_v6 = vld [vmem:[%s3079_s30 + $0xc48] sm:$0xff] }
 0x1a3   : > { %v2537_v13 = vpop.eup %2536  ;;  %1513 = vst [vmem:[%s3101_s17 + $0xaf8] sm:$0xff] %v2535_v11  ;;  %2556 = vtanh.f32 %v500_v8  ;;  %v532_v8 = vld [vmem:[%s3079_s30 + $0xc50] sm:$0xff] }
 0x1a4   : > { %v2539_v15 = vpop.eup %2538  ;;  %1514 = vst [vmem:[%s3101_s17 + $0xb00] sm:$0xff] %v2537_v13  ;;  %2558 = vtanh.f32 %v501_v10  ;;  %v533_v10 = vld [vmem:[%s3079_s30 + $0xc58] sm:$0xff] }
 0x1a5   : > { %v2541_v17 = vpop.eup %2540  ;;  %1515 = vst [vmem:[%s3101_s17 + $0xb08] sm:$0xff] %v2539_v15  ;;  %2560 = vtanh.f32 %v502_v12  ;;  %v534_v12 = vld [vmem:[%s3079_s30 + $0xc60] sm:$0xff] }
 0x1a6   : > { %v2543_v19 = vpop.eup %2542  ;;  %1516 = vst [vmem:[%s3101_s17 + $0xb10] sm:$0xff] %v2541_v17  ;;  %2562 = vtanh.f32 %v503_v14  ;;  %v535_v14 = vld [vmem:[%s3079_s30 + $0xc68] sm:$0xff] }
 0x1a7   : > { %v2545_v21 = vpop.eup %2544  ;;  %1517 = vst [vmem:[%s3101_s17 + $0xb18] sm:$0xff] %v2543_v19  ;;  %2564 = vtanh.f32 %v504_v16  ;;  %v536_v16 = vld [vmem:[%s3079_s30 + $0xc70] sm:$0xff] }
 0x1a8   : > { %v2547_v23 = vpop.eup %2546  ;;  %1518 = vst [vmem:[%s3101_s17 + $0xb20] sm:$0xff] %v2545_v21  ;;  %2566 = vtanh.f32 %v505_v18  ;;  %v537_v18 = vld [vmem:[%s3079_s30 + $0xc78] sm:$0xff] }
 0x1a9   : > { %v2549_v25 = vpop.eup %2548  ;;  %1519 = vst [vmem:[%s3101_s17 + $0xb28] sm:$0xff] %v2547_v23  ;;  %2568 = vtanh.f32 %v506_v20  ;;  %v538_v20 = vld [vmem:[%s3079_s30 + $0xc80] sm:$0xff] }
 0x1aa   : > { %v2551_v27 = vpop.eup %2550  ;;  %1520 = vst [vmem:[%s3101_s17 + $0xb30] sm:$0xff] %v2549_v25  ;;  %2570 = vtanh.f32 %v507_v22  ;;  %v539_v22 = vld [vmem:[%s3079_s30 + $0xc88] sm:$0xff] }
 0x1ab   : > { %v2553_v29 = vpop.eup %2552  ;;  %1521 = vst [vmem:[%s3101_s17 + $0xb38] sm:$0xff] %v2551_v27  ;;  %2572 = vtanh.f32 %v508_v24  ;;  %v540_v24 = vld [vmem:[%s3079_s30 + $0xc90] sm:$0xff] }
 0x1ac   : > { %v2555_v31 = vpop.eup %2554  ;;  %1522 = vst [vmem:[%s3101_s17 + $0xb40] sm:$0xff] %v2553_v29  ;;  %2574 = vtanh.f32 %v509_v26  ;;  %v541_v26 = vld [vmem:[%s3079_s30 + $0xc98] sm:$0xff] }
 0x1ad   : > { %v2557_v33 = vpop.eup %2556  ;;  %1523 = vst [vmem:[%s3101_s17 + $0xb48] sm:$0xff] %v2555_v31  ;;  %2576 = vtanh.f32 %v510_v28  ;;  %v542_v28 = vld [vmem:[%s3079_s30 + $0xca0] sm:$0xff] }
 0x1ae   : > { %v2559_v35 = vpop.eup %2558  ;;  %1524 = vst [vmem:[%s3101_s17 + $0xb50] sm:$0xff] %v2557_v33  ;;  %2578 = vtanh.f32 %v511_v30  ;;  %v543_v30 = vld [vmem:[%s3079_s30 + $0xca8] sm:$0xff] }
 0x1af   : > { %v2561_v37 = vpop.eup %2560  ;;  %1525 = vst [vmem:[%s3101_s17 + $0xb58] sm:$0xff] %v2559_v35  ;;  %2580 = vtanh.f32 %v512_v32  ;;  %v544_v32 = vld [vmem:[%s3079_s30 + $0xcb0] sm:$0xff] }
 0x1b0   : > { %v2563_v39 = vpop.eup %2562  ;;  %1526 = vst [vmem:[%s3101_s17 + $0xb60] sm:$0xff] %v2561_v37  ;;  %2582 = vtanh.f32 %v513_v34  ;;  %v545_v34 = vld [vmem:[%s3079_s30 + $0xcb8] sm:$0xff] }
 0x1b1   : > { %v2565_v41 = vpop.eup %2564  ;;  %1527 = vst [vmem:[%s3101_s17 + $0xb68] sm:$0xff] %v2563_v39  ;;  %2584 = vtanh.f32 %v514_v36  ;;  %v546_v36 = vld [vmem:[%s3079_s30 + $0xcc0] sm:$0xff] }
 0x1b2   : > { %v2567_v43 = vpop.eup %2566  ;;  %1528 = vst [vmem:[%s3101_s17 + $0xb70] sm:$0xff] %v2565_v41  ;;  %2586 = vtanh.f32 %v515_v38  ;;  %v547_v38 = vld [vmem:[%s3079_s30 + $0xcc8] sm:$0xff] }
 0x1b3   : > { %v2569_v45 = vpop.eup %2568  ;;  %1529 = vst [vmem:[%s3101_s17 + $0xb78] sm:$0xff] %v2567_v43  ;;  %2588 = vtanh.f32 %v516_v40  ;;  %v548_v40 = vld [vmem:[%s3079_s30 + $0xcd0] sm:$0xff] }
 0x1b4   : > { %v2571_v47 = vpop.eup %2570  ;;  %1530 = vst [vmem:[%s3101_s17 + $0xb80] sm:$0xff] %v2569_v45  ;;  %2590 = vtanh.f32 %v517_v42  ;;  %v549_v42 = vld [vmem:[%s3079_s30 + $0xcd8] sm:$0xff] }
 0x1b5   : > { %v2573_v49 = vpop.eup %2572  ;;  %1531 = vst [vmem:[%s3101_s17 + $0xb88] sm:$0xff] %v2571_v47  ;;  %2592 = vtanh.f32 %v518_v44  ;;  %v550_v44 = vld [vmem:[%s3079_s30 + $0xce0] sm:$0xff] }
 0x1b6   : > { %v2575_v51 = vpop.eup %2574  ;;  %1532 = vst [vmem:[%s3101_s17 + $0xb90] sm:$0xff] %v2573_v49  ;;  %2594 = vtanh.f32 %v519_v46  ;;  %v551_v46 = vld [vmem:[%s3079_s30 + $0xce8] sm:$0xff] }
 0x1b7   : > { %v2577_v53 = vpop.eup %2576  ;;  %1533 = vst [vmem:[%s3101_s17 + $0xb98] sm:$0xff] %v2575_v51  ;;  %2596 = vtanh.f32 %v520_v48  ;;  %v552_v48 = vld [vmem:[%s3079_s30 + $0xcf0] sm:$0xff] }
 0x1b8   : > { %v2579_v55 = vpop.eup %2578  ;;  %1534 = vst [vmem:[%s3101_s17 + $0xba0] sm:$0xff] %v2577_v53  ;;  %2598 = vtanh.f32 %v521_v50  ;;  %v553_v50 = vld [vmem:[%s3079_s30 + $0xcf8] sm:$0xff] }
 0x1b9   : > { %v2581_v57 = vpop.eup %2580  ;;  %1535 = vst [vmem:[%s3101_s17 + $0xba8] sm:$0xff] %v2579_v55  ;;  %2600 = vtanh.f32 %v522_v52  ;;  %v554_v52 = vld [vmem:[%s3079_s30 + $0xd00] sm:$0xff] }
 0x1ba   : > { %v2583_v59 = vpop.eup %2582  ;;  %1536 = vst [vmem:[%s3101_s17 + $0xbb0] sm:$0xff] %v2581_v57  ;;  %2602 = vtanh.f32 %v523_v54  ;;  %v555_v54 = vld [vmem:[%s3079_s30 + $0xd08] sm:$0xff] }
 0x1bb   : > { %v2585_v61 = vpop.eup %2584  ;;  %1537 = vst [vmem:[%s3101_s17 + $0xbb8] sm:$0xff] %v2583_v59  ;;  %2604 = vtanh.f32 %v524_v56  ;;  %v556_v56 = vld [vmem:[%s3079_s30 + $0xd10] sm:$0xff] }
 0x1bc   : > { %v2587_v63 = vpop.eup %2586  ;;  %1538 = vst [vmem:[%s3101_s17 + $0xbc0] sm:$0xff] %v2585_v61  ;;  %2606 = vtanh.f32 %v525_v58  ;;  %v557_v58 = vld [vmem:[%s3079_s30 + $0xd18] sm:$0xff] }
 0x1bd   : > { %v2589_v1 = vpop.eup %2588  ;;  %1539 = vst [vmem:[%s3101_s17 + $0xbc8] sm:$0xff] %v2587_v63  ;;  %2608 = vtanh.f32 %v526_v60  ;;  %v558_v60 = vld [vmem:[%s3079_s30 + $0xd20] sm:$0xff] }
 0x1be   : > { %v2591_v3 = vpop.eup %2590  ;;  %1540 = vst [vmem:[%s3101_s17 + $0xbd0] sm:$0xff] %v2589_v1  ;;  %2610 = vtanh.f32 %v527_v62  ;;  %v559_v62 = vld [vmem:[%s3079_s30 + $0xd28] sm:$0xff] }
 0x1bf   : > { %v2593_v5 = vpop.eup %2592  ;;  %1541 = vst [vmem:[%s3101_s17 + $0xbd8] sm:$0xff] %v2591_v3  ;;  %2612 = vtanh.f32 %v528_v0  ;;  %v560_v0 = vld [vmem:[%s3079_s30 + $0xd30] sm:$0xff] }
 0x1c0   : > { %v2595_v7 = vpop.eup %2594  ;;  %1542 = vst [vmem:[%s3101_s17 + $0xbe0] sm:$0xff] %v2593_v5  ;;  %2614 = vtanh.f32 %v529_v2  ;;  %v561_v2 = vld [vmem:[%s3079_s30 + $0xd38] sm:$0xff] }
 0x1c1   : > { %v2597_v9 = vpop.eup %2596  ;;  %1543 = vst [vmem:[%s3101_s17 + $0xbe8] sm:$0xff] %v2595_v7  ;;  %2616 = vtanh.f32 %v530_v4  ;;  %v562_v4 = vld [vmem:[%s3079_s30 + $0xd40] sm:$0xff] }
 0x1c2   : > { %v2599_v11 = vpop.eup %2598  ;;  %1544 = vst [vmem:[%s3101_s17 + $0xbf0] sm:$0xff] %v2597_v9  ;;  %2618 = vtanh.f32 %v531_v6  ;;  %v563_v6 = vld [vmem:[%s3079_s30 + $0xd48] sm:$0xff] }
 0x1c3   : > { %v2601_v13 = vpop.eup %2600  ;;  %1545 = vst [vmem:[%s3101_s17 + $0xbf8] sm:$0xff] %v2599_v11  ;;  %2620 = vtanh.f32 %v532_v8  ;;  %v564_v8 = vld [vmem:[%s3079_s30 + $0xd50] sm:$0xff] }
 0x1c4   : > { %v2603_v15 = vpop.eup %2602  ;;  %1546 = vst [vmem:[%s3101_s17 + $0xc00] sm:$0xff] %v2601_v13  ;;  %2622 = vtanh.f32 %v533_v10  ;;  %v565_v10 = vld [vmem:[%s3079_s30 + $0xd58] sm:$0xff] }
 0x1c5   : > { %v2605_v17 = vpop.eup %2604  ;;  %1547 = vst [vmem:[%s3101_s17 + $0xc08] sm:$0xff] %v2603_v15  ;;  %2624 = vtanh.f32 %v534_v12  ;;  %v566_v12 = vld [vmem:[%s3079_s30 + $0xd60] sm:$0xff] }
 0x1c6   : > { %v2607_v19 = vpop.eup %2606  ;;  %1548 = vst [vmem:[%s3101_s17 + $0xc10] sm:$0xff] %v2605_v17  ;;  %2626 = vtanh.f32 %v535_v14  ;;  %v567_v14 = vld [vmem:[%s3079_s30 + $0xd68] sm:$0xff] }
 0x1c7   : > { %v2609_v21 = vpop.eup %2608  ;;  %1549 = vst [vmem:[%s3101_s17 + $0xc18] sm:$0xff] %v2607_v19  ;;  %2628 = vtanh.f32 %v536_v16  ;;  %v568_v16 = vld [vmem:[%s3079_s30 + $0xd70] sm:$0xff] }
 0x1c8   : > { %v2611_v23 = vpop.eup %2610  ;;  %1550 = vst [vmem:[%s3101_s17 + $0xc20] sm:$0xff] %v2609_v21  ;;  %2630 = vtanh.f32 %v537_v18  ;;  %v569_v18 = vld [vmem:[%s3079_s30 + $0xd78] sm:$0xff] }
 0x1c9   : > { %v2613_v25 = vpop.eup %2612  ;;  %1551 = vst [vmem:[%s3101_s17 + $0xc28] sm:$0xff] %v2611_v23  ;;  %2632 = vtanh.f32 %v538_v20  ;;  %v570_v20 = vld [vmem:[%s3079_s30 + $0xd80] sm:$0xff] }
 0x1ca   : > { %v2615_v27 = vpop.eup %2614  ;;  %1552 = vst [vmem:[%s3101_s17 + $0xc30] sm:$0xff] %v2613_v25  ;;  %2634 = vtanh.f32 %v539_v22  ;;  %v571_v22 = vld [vmem:[%s3079_s30 + $0xd88] sm:$0xff] }
 0x1cb   : > { %v2617_v29 = vpop.eup %2616  ;;  %1553 = vst [vmem:[%s3101_s17 + $0xc38] sm:$0xff] %v2615_v27  ;;  %2636 = vtanh.f32 %v540_v24  ;;  %v572_v24 = vld [vmem:[%s3079_s30 + $0xd90] sm:$0xff] }
 0x1cc   : > { %v2619_v31 = vpop.eup %2618  ;;  %1554 = vst [vmem:[%s3101_s17 + $0xc40] sm:$0xff] %v2617_v29  ;;  %2638 = vtanh.f32 %v541_v26  ;;  %v573_v26 = vld [vmem:[%s3079_s30 + $0xd98] sm:$0xff] }
 0x1cd   : > { %v2621_v33 = vpop.eup %2620  ;;  %1555 = vst [vmem:[%s3101_s17 + $0xc48] sm:$0xff] %v2619_v31  ;;  %2640 = vtanh.f32 %v542_v28  ;;  %v574_v28 = vld [vmem:[%s3079_s30 + $0xda0] sm:$0xff] }
 0x1ce   : > { %v2623_v35 = vpop.eup %2622  ;;  %1556 = vst [vmem:[%s3101_s17 + $0xc50] sm:$0xff] %v2621_v33  ;;  %2642 = vtanh.f32 %v543_v30  ;;  %v575_v30 = vld [vmem:[%s3079_s30 + $0xda8] sm:$0xff] }
 0x1cf   : > { %v2625_v37 = vpop.eup %2624  ;;  %1557 = vst [vmem:[%s3101_s17 + $0xc58] sm:$0xff] %v2623_v35  ;;  %2644 = vtanh.f32 %v544_v32  ;;  %v576_v32 = vld [vmem:[%s3079_s30 + $0xdb0] sm:$0xff] }
 0x1d0   : > { %v2627_v39 = vpop.eup %2626  ;;  %1558 = vst [vmem:[%s3101_s17 + $0xc60] sm:$0xff] %v2625_v37  ;;  %2646 = vtanh.f32 %v545_v34  ;;  %v577_v34 = vld [vmem:[%s3079_s30 + $0xdb8] sm:$0xff] }
 0x1d1   : > { %v2629_v41 = vpop.eup %2628  ;;  %1559 = vst [vmem:[%s3101_s17 + $0xc68] sm:$0xff] %v2627_v39  ;;  %2648 = vtanh.f32 %v546_v36  ;;  %v578_v36 = vld [vmem:[%s3079_s30 + $0xdc0] sm:$0xff] }
 0x1d2   : > { %v2631_v43 = vpop.eup %2630  ;;  %1560 = vst [vmem:[%s3101_s17 + $0xc70] sm:$0xff] %v2629_v41  ;;  %2650 = vtanh.f32 %v547_v38  ;;  %v579_v38 = vld [vmem:[%s3079_s30 + $0xdc8] sm:$0xff] }
 0x1d3   : > { %v2633_v45 = vpop.eup %2632  ;;  %1561 = vst [vmem:[%s3101_s17 + $0xc78] sm:$0xff] %v2631_v43  ;;  %2652 = vtanh.f32 %v548_v40  ;;  %v580_v40 = vld [vmem:[%s3079_s30 + $0xdd0] sm:$0xff] }
 0x1d4   : > { %v2635_v47 = vpop.eup %2634  ;;  %1562 = vst [vmem:[%s3101_s17 + $0xc80] sm:$0xff] %v2633_v45  ;;  %2654 = vtanh.f32 %v549_v42  ;;  %v581_v42 = vld [vmem:[%s3079_s30 + $0xdd8] sm:$0xff] }
 0x1d5   : > { %v2637_v49 = vpop.eup %2636  ;;  %1563 = vst [vmem:[%s3101_s17 + $0xc88] sm:$0xff] %v2635_v47  ;;  %2656 = vtanh.f32 %v550_v44  ;;  %v582_v44 = vld [vmem:[%s3079_s30 + $0xde0] sm:$0xff] }
 0x1d6   : > { %v2639_v51 = vpop.eup %2638  ;;  %1564 = vst [vmem:[%s3101_s17 + $0xc90] sm:$0xff] %v2637_v49  ;;  %2658 = vtanh.f32 %v551_v46  ;;  %v583_v46 = vld [vmem:[%s3079_s30 + $0xde8] sm:$0xff] }
 0x1d7   : > { %v2641_v53 = vpop.eup %2640  ;;  %1565 = vst [vmem:[%s3101_s17 + $0xc98] sm:$0xff] %v2639_v51  ;;  %2660 = vtanh.f32 %v552_v48  ;;  %v584_v48 = vld [vmem:[%s3079_s30 + $0xdf0] sm:$0xff] }
 0x1d8   : > { %v2643_v55 = vpop.eup %2642  ;;  %1566 = vst [vmem:[%s3101_s17 + $0xca0] sm:$0xff] %v2641_v53  ;;  %2662 = vtanh.f32 %v553_v50  ;;  %v585_v50 = vld [vmem:[%s3079_s30 + $0xdf8] sm:$0xff] }
 0x1d9   : > { %v2645_v57 = vpop.eup %2644  ;;  %1567 = vst [vmem:[%s3101_s17 + $0xca8] sm:$0xff] %v2643_v55  ;;  %2664 = vtanh.f32 %v554_v52  ;;  %v586_v52 = vld [vmem:[%s3079_s30 + $0xe00] sm:$0xff] }
 0x1da   : > { %v2647_v59 = vpop.eup %2646  ;;  %1568 = vst [vmem:[%s3101_s17 + $0xcb0] sm:$0xff] %v2645_v57  ;;  %2666 = vtanh.f32 %v555_v54  ;;  %v587_v54 = vld [vmem:[%s3079_s30 + $0xe08] sm:$0xff] }
 0x1db   : > { %v2649_v61 = vpop.eup %2648  ;;  %1569 = vst [vmem:[%s3101_s17 + $0xcb8] sm:$0xff] %v2647_v59  ;;  %2668 = vtanh.f32 %v556_v56  ;;  %v588_v56 = vld [vmem:[%s3079_s30 + $0xe10] sm:$0xff] }
 0x1dc   : > { %v2651_v63 = vpop.eup %2650  ;;  %1570 = vst [vmem:[%s3101_s17 + $0xcc0] sm:$0xff] %v2649_v61  ;;  %2670 = vtanh.f32 %v557_v58  ;;  %v589_v58 = vld [vmem:[%s3079_s30 + $0xe18] sm:$0xff] }
 0x1dd   : > { %v2653_v1 = vpop.eup %2652  ;;  %1571 = vst [vmem:[%s3101_s17 + $0xcc8] sm:$0xff] %v2651_v63  ;;  %2672 = vtanh.f32 %v558_v60  ;;  %v590_v60 = vld [vmem:[%s3079_s30 + $0xe20] sm:$0xff] }
 0x1de   : > { %v2655_v3 = vpop.eup %2654  ;;  %1572 = vst [vmem:[%s3101_s17 + $0xcd0] sm:$0xff] %v2653_v1  ;;  %2674 = vtanh.f32 %v559_v62  ;;  %v591_v62 = vld [vmem:[%s3079_s30 + $0xe28] sm:$0xff] }
 0x1df   : > { %v2657_v5 = vpop.eup %2656  ;;  %1573 = vst [vmem:[%s3101_s17 + $0xcd8] sm:$0xff] %v2655_v3  ;;  %2676 = vtanh.f32 %v560_v0  ;;  %v592_v0 = vld [vmem:[%s3079_s30 + $0xe30] sm:$0xff] }
 0x1e0   : > { %v2659_v7 = vpop.eup %2658  ;;  %1574 = vst [vmem:[%s3101_s17 + $0xce0] sm:$0xff] %v2657_v5  ;;  %2678 = vtanh.f32 %v561_v2  ;;  %v593_v2 = vld [vmem:[%s3079_s30 + $0xe38] sm:$0xff] }
 0x1e1   : > { %v2661_v9 = vpop.eup %2660  ;;  %1575 = vst [vmem:[%s3101_s17 + $0xce8] sm:$0xff] %v2659_v7  ;;  %2680 = vtanh.f32 %v562_v4  ;;  %v594_v4 = vld [vmem:[%s3079_s30 + $0xe40] sm:$0xff] }
 0x1e2   : > { %v2663_v11 = vpop.eup %2662  ;;  %1576 = vst [vmem:[%s3101_s17 + $0xcf0] sm:$0xff] %v2661_v9  ;;  %2682 = vtanh.f32 %v563_v6  ;;  %v595_v6 = vld [vmem:[%s3079_s30 + $0xe48] sm:$0xff] }
 0x1e3   : > { %v2665_v13 = vpop.eup %2664  ;;  %1577 = vst [vmem:[%s3101_s17 + $0xcf8] sm:$0xff] %v2663_v11  ;;  %2684 = vtanh.f32 %v564_v8  ;;  %v596_v8 = vld [vmem:[%s3079_s30 + $0xe50] sm:$0xff] }
 0x1e4   : > { %v2667_v15 = vpop.eup %2666  ;;  %1578 = vst [vmem:[%s3101_s17 + $0xd00] sm:$0xff] %v2665_v13  ;;  %2686 = vtanh.f32 %v565_v10  ;;  %v597_v10 = vld [vmem:[%s3079_s30 + $0xe58] sm:$0xff] }
 0x1e5   : > { %v2669_v17 = vpop.eup %2668  ;;  %1579 = vst [vmem:[%s3101_s17 + $0xd08] sm:$0xff] %v2667_v15  ;;  %2688 = vtanh.f32 %v566_v12  ;;  %v598_v12 = vld [vmem:[%s3079_s30 + $0xe60] sm:$0xff] }
 0x1e6   : > { %v2671_v19 = vpop.eup %2670  ;;  %1580 = vst [vmem:[%s3101_s17 + $0xd10] sm:$0xff] %v2669_v17  ;;  %2690 = vtanh.f32 %v567_v14  ;;  %v599_v14 = vld [vmem:[%s3079_s30 + $0xe68] sm:$0xff] }
 0x1e7   : > { %v2673_v21 = vpop.eup %2672  ;;  %1581 = vst [vmem:[%s3101_s17 + $0xd18] sm:$0xff] %v2671_v19  ;;  %2692 = vtanh.f32 %v568_v16  ;;  %v600_v16 = vld [vmem:[%s3079_s30 + $0xe70] sm:$0xff] }
 0x1e8   : > { %v2675_v23 = vpop.eup %2674  ;;  %1582 = vst [vmem:[%s3101_s17 + $0xd20] sm:$0xff] %v2673_v21  ;;  %2694 = vtanh.f32 %v569_v18  ;;  %v601_v18 = vld [vmem:[%s3079_s30 + $0xe78] sm:$0xff] }
 0x1e9   : > { %v2677_v25 = vpop.eup %2676  ;;  %1583 = vst [vmem:[%s3101_s17 + $0xd28] sm:$0xff] %v2675_v23  ;;  %2696 = vtanh.f32 %v570_v20  ;;  %v602_v20 = vld [vmem:[%s3079_s30 + $0xe80] sm:$0xff] }
 0x1ea   : > { %v2679_v27 = vpop.eup %2678  ;;  %1584 = vst [vmem:[%s3101_s17 + $0xd30] sm:$0xff] %v2677_v25  ;;  %2698 = vtanh.f32 %v571_v22  ;;  %v603_v22 = vld [vmem:[%s3079_s30 + $0xe88] sm:$0xff] }
 0x1eb   : > { %v2681_v29 = vpop.eup %2680  ;;  %1585 = vst [vmem:[%s3101_s17 + $0xd38] sm:$0xff] %v2679_v27  ;;  %2700 = vtanh.f32 %v572_v24  ;;  %v604_v24 = vld [vmem:[%s3079_s30 + $0xe90] sm:$0xff] }
 0x1ec   : > { %v2683_v31 = vpop.eup %2682  ;;  %1586 = vst [vmem:[%s3101_s17 + $0xd40] sm:$0xff] %v2681_v29  ;;  %2702 = vtanh.f32 %v573_v26  ;;  %v605_v26 = vld [vmem:[%s3079_s30 + $0xe98] sm:$0xff] }
 0x1ed   : > { %v2685_v33 = vpop.eup %2684  ;;  %1587 = vst [vmem:[%s3101_s17 + $0xd48] sm:$0xff] %v2683_v31  ;;  %2704 = vtanh.f32 %v574_v28  ;;  %v606_v28 = vld [vmem:[%s3079_s30 + $0xea0] sm:$0xff] }
 0x1ee   : > { %v2687_v35 = vpop.eup %2686  ;;  %1588 = vst [vmem:[%s3101_s17 + $0xd50] sm:$0xff] %v2685_v33  ;;  %2706 = vtanh.f32 %v575_v30  ;;  %v607_v30 = vld [vmem:[%s3079_s30 + $0xea8] sm:$0xff] }
 0x1ef   : > { %v2689_v37 = vpop.eup %2688  ;;  %1589 = vst [vmem:[%s3101_s17 + $0xd58] sm:$0xff] %v2687_v35  ;;  %2708 = vtanh.f32 %v576_v32  ;;  %v608_v32 = vld [vmem:[%s3079_s30 + $0xeb0] sm:$0xff] }
 0x1f0   : > { %v2691_v39 = vpop.eup %2690  ;;  %1590 = vst [vmem:[%s3101_s17 + $0xd60] sm:$0xff] %v2689_v37  ;;  %2710 = vtanh.f32 %v577_v34  ;;  %v609_v34 = vld [vmem:[%s3079_s30 + $0xeb8] sm:$0xff] }
 0x1f1   : > { %v2693_v41 = vpop.eup %2692  ;;  %1591 = vst [vmem:[%s3101_s17 + $0xd68] sm:$0xff] %v2691_v39  ;;  %2712 = vtanh.f32 %v578_v36  ;;  %v610_v36 = vld [vmem:[%s3079_s30 + $0xec0] sm:$0xff] }
 0x1f2   : > { %v2695_v43 = vpop.eup %2694  ;;  %1592 = vst [vmem:[%s3101_s17 + $0xd70] sm:$0xff] %v2693_v41  ;;  %2714 = vtanh.f32 %v579_v38  ;;  %v611_v38 = vld [vmem:[%s3079_s30 + $0xec8] sm:$0xff] }
 0x1f3   : > { %v2697_v45 = vpop.eup %2696  ;;  %1593 = vst [vmem:[%s3101_s17 + $0xd78] sm:$0xff] %v2695_v43  ;;  %2716 = vtanh.f32 %v580_v40  ;;  %v612_v40 = vld [vmem:[%s3079_s30 + $0xed0] sm:$0xff] }
 0x1f4   : > { %v2699_v47 = vpop.eup %2698  ;;  %1594 = vst [vmem:[%s3101_s17 + $0xd80] sm:$0xff] %v2697_v45  ;;  %2718 = vtanh.f32 %v581_v42  ;;  %v613_v42 = vld [vmem:[%s3079_s30 + $0xed8] sm:$0xff] }
 0x1f5   : > { %v2701_v49 = vpop.eup %2700  ;;  %1595 = vst [vmem:[%s3101_s17 + $0xd88] sm:$0xff] %v2699_v47  ;;  %2720 = vtanh.f32 %v582_v44  ;;  %v614_v44 = vld [vmem:[%s3079_s30 + $0xee0] sm:$0xff] }
 0x1f6   : > { %v2703_v51 = vpop.eup %2702  ;;  %1596 = vst [vmem:[%s3101_s17 + $0xd90] sm:$0xff] %v2701_v49  ;;  %2722 = vtanh.f32 %v583_v46  ;;  %v615_v46 = vld [vmem:[%s3079_s30 + $0xee8] sm:$0xff] }
 0x1f7   : > { %v2705_v53 = vpop.eup %2704  ;;  %1597 = vst [vmem:[%s3101_s17 + $0xd98] sm:$0xff] %v2703_v51  ;;  %2724 = vtanh.f32 %v584_v48  ;;  %v616_v48 = vld [vmem:[%s3079_s30 + $0xef0] sm:$0xff] }
 0x1f8   : > { %v2707_v55 = vpop.eup %2706  ;;  %1598 = vst [vmem:[%s3101_s17 + $0xda0] sm:$0xff] %v2705_v53  ;;  %2726 = vtanh.f32 %v585_v50  ;;  %v617_v50 = vld [vmem:[%s3079_s30 + $0xef8] sm:$0xff] }
 0x1f9   : > { %v2709_v57 = vpop.eup %2708  ;;  %1599 = vst [vmem:[%s3101_s17 + $0xda8] sm:$0xff] %v2707_v55  ;;  %2728 = vtanh.f32 %v586_v52  ;;  %v618_v52 = vld [vmem:[%s3079_s30 + $0xf00] sm:$0xff] }
 0x1fa   : > { %v2711_v59 = vpop.eup %2710  ;;  %1600 = vst [vmem:[%s3101_s17 + $0xdb0] sm:$0xff] %v2709_v57  ;;  %2730 = vtanh.f32 %v587_v54  ;;  %v619_v54 = vld [vmem:[%s3079_s30 + $0xf08] sm:$0xff] }
 0x1fb   : > { %v2713_v61 = vpop.eup %2712  ;;  %1601 = vst [vmem:[%s3101_s17 + $0xdb8] sm:$0xff] %v2711_v59  ;;  %2732 = vtanh.f32 %v588_v56  ;;  %v620_v56 = vld [vmem:[%s3079_s30 + $0xf10] sm:$0xff] }
 0x1fc   : > { %v2715_v63 = vpop.eup %2714  ;;  %1602 = vst [vmem:[%s3101_s17 + $0xdc0] sm:$0xff] %v2713_v61  ;;  %2734 = vtanh.f32 %v589_v58  ;;  %v621_v58 = vld [vmem:[%s3079_s30 + $0xf18] sm:$0xff] }
 0x1fd   : > { %v2717_v1 = vpop.eup %2716  ;;  %1603 = vst [vmem:[%s3101_s17 + $0xdc8] sm:$0xff] %v2715_v63  ;;  %2736 = vtanh.f32 %v590_v60  ;;  %v622_v60 = vld [vmem:[%s3079_s30 + $0xf20] sm:$0xff] }
 0x1fe   : > { %v2719_v3 = vpop.eup %2718  ;;  %1604 = vst [vmem:[%s3101_s17 + $0xdd0] sm:$0xff] %v2717_v1  ;;  %2738 = vtanh.f32 %v591_v62  ;;  %v623_v62 = vld [vmem:[%s3079_s30 + $0xf28] sm:$0xff] }
 0x1ff   : > { %v2721_v5 = vpop.eup %2720  ;;  %1605 = vst [vmem:[%s3101_s17 + $0xdd8] sm:$0xff] %v2719_v3  ;;  %2740 = vtanh.f32 %v592_v0  ;;  %v624_v0 = vld [vmem:[%s3079_s30 + $0xf30] sm:$0xff] }
 0x200   : > { %v2723_v7 = vpop.eup %2722  ;;  %1606 = vst [vmem:[%s3101_s17 + $0xde0] sm:$0xff] %v2721_v5  ;;  %2742 = vtanh.f32 %v593_v2  ;;  %v625_v2 = vld [vmem:[%s3079_s30 + $0xf38] sm:$0xff] }
 0x201   : > { %v2725_v9 = vpop.eup %2724  ;;  %1607 = vst [vmem:[%s3101_s17 + $0xde8] sm:$0xff] %v2723_v7  ;;  %2744 = vtanh.f32 %v594_v4  ;;  %v626_v4 = vld [vmem:[%s3079_s30 + $0xf40] sm:$0xff] }
 0x202   : > { %v2727_v11 = vpop.eup %2726  ;;  %1608 = vst [vmem:[%s3101_s17 + $0xdf0] sm:$0xff] %v2725_v9  ;;  %2746 = vtanh.f32 %v595_v6  ;;  %v627_v6 = vld [vmem:[%s3079_s30 + $0xf48] sm:$0xff] }
 0x203   : > { %v2729_v13 = vpop.eup %2728  ;;  %1609 = vst [vmem:[%s3101_s17 + $0xdf8] sm:$0xff] %v2727_v11  ;;  %2748 = vtanh.f32 %v596_v8  ;;  %v628_v8 = vld [vmem:[%s3079_s30 + $0xf50] sm:$0xff] }
 0x204   : > { %v2731_v15 = vpop.eup %2730  ;;  %1610 = vst [vmem:[%s3101_s17 + $0xe00] sm:$0xff] %v2729_v13  ;;  %2750 = vtanh.f32 %v597_v10  ;;  %v629_v10 = vld [vmem:[%s3079_s30 + $0xf58] sm:$0xff] }
 0x205   : > { %v2733_v17 = vpop.eup %2732  ;;  %1611 = vst [vmem:[%s3101_s17 + $0xe08] sm:$0xff] %v2731_v15  ;;  %2752 = vtanh.f32 %v598_v12  ;;  %v630_v12 = vld [vmem:[%s3079_s30 + $0xf60] sm:$0xff] }
 0x206   : > { %v2735_v19 = vpop.eup %2734  ;;  %1612 = vst [vmem:[%s3101_s17 + $0xe10] sm:$0xff] %v2733_v17  ;;  %2754 = vtanh.f32 %v599_v14  ;;  %v631_v14 = vld [vmem:[%s3079_s30 + $0xf68] sm:$0xff] }
 0x207   : > { %v2737_v21 = vpop.eup %2736  ;;  %1613 = vst [vmem:[%s3101_s17 + $0xe18] sm:$0xff] %v2735_v19  ;;  %2756 = vtanh.f32 %v600_v16  ;;  %v632_v16 = vld [vmem:[%s3079_s30 + $0xf70] sm:$0xff] }
 0x208   : > { %v2739_v23 = vpop.eup %2738  ;;  %1614 = vst [vmem:[%s3101_s17 + $0xe20] sm:$0xff] %v2737_v21  ;;  %2758 = vtanh.f32 %v601_v18  ;;  %v633_v18 = vld [vmem:[%s3079_s30 + $0xf78] sm:$0xff] }
 0x209   : > { %v2741_v25 = vpop.eup %2740  ;;  %1615 = vst [vmem:[%s3101_s17 + $0xe28] sm:$0xff] %v2739_v23  ;;  %2760 = vtanh.f32 %v602_v20  ;;  %v634_v20 = vld [vmem:[%s3079_s30 + $0xf80] sm:$0xff] }
 0x20a   : > { %v2743_v27 = vpop.eup %2742  ;;  %1616 = vst [vmem:[%s3101_s17 + $0xe30] sm:$0xff] %v2741_v25  ;;  %2762 = vtanh.f32 %v603_v22  ;;  %v635_v22 = vld [vmem:[%s3079_s30 + $0xf88] sm:$0xff] }
 0x20b   : > { %v2745_v29 = vpop.eup %2744  ;;  %1617 = vst [vmem:[%s3101_s17 + $0xe38] sm:$0xff] %v2743_v27  ;;  %2764 = vtanh.f32 %v604_v24  ;;  %v636_v24 = vld [vmem:[%s3079_s30 + $0xf90] sm:$0xff] }
 0x20c   : > { %v2747_v31 = vpop.eup %2746  ;;  %1618 = vst [vmem:[%s3101_s17 + $0xe40] sm:$0xff] %v2745_v29  ;;  %2766 = vtanh.f32 %v605_v26  ;;  %v637_v26 = vld [vmem:[%s3079_s30 + $0xf98] sm:$0xff] }
 0x20d   : > { %v2749_v33 = vpop.eup %2748  ;;  %1619 = vst [vmem:[%s3101_s17 + $0xe48] sm:$0xff] %v2747_v31  ;;  %2768 = vtanh.f32 %v606_v28  ;;  %v638_v28 = vld [vmem:[%s3079_s30 + $0xfa0] sm:$0xff] }
 0x20e   : > { %v2751_v35 = vpop.eup %2750  ;;  %1620 = vst [vmem:[%s3101_s17 + $0xe50] sm:$0xff] %v2749_v33  ;;  %2770 = vtanh.f32 %v607_v30  ;;  %v639_v30 = vld [vmem:[%s3079_s30 + $0xfa8] sm:$0xff] }
 0x20f   : > { %v2753_v37 = vpop.eup %2752  ;;  %1621 = vst [vmem:[%s3101_s17 + $0xe58] sm:$0xff] %v2751_v35  ;;  %2772 = vtanh.f32 %v608_v32  ;;  %v640_v32 = vld [vmem:[%s3079_s30 + $0xfb0] sm:$0xff] }
 0x210   : > { %v2755_v39 = vpop.eup %2754  ;;  %1622 = vst [vmem:[%s3101_s17 + $0xe60] sm:$0xff] %v2753_v37  ;;  %2774 = vtanh.f32 %v609_v34  ;;  %v641_v34 = vld [vmem:[%s3079_s30 + $0xfb8] sm:$0xff] }
 0x211   : > { %v2757_v41 = vpop.eup %2756  ;;  %1623 = vst [vmem:[%s3101_s17 + $0xe68] sm:$0xff] %v2755_v39  ;;  %2776 = vtanh.f32 %v610_v36  ;;  %v642_v36 = vld [vmem:[%s3079_s30 + $0xfc0] sm:$0xff] }
 0x212   : > { %v2759_v43 = vpop.eup %2758  ;;  %1624 = vst [vmem:[%s3101_s17 + $0xe70] sm:$0xff] %v2757_v41  ;;  %2778 = vtanh.f32 %v611_v38  ;;  %v643_v38 = vld [vmem:[%s3079_s30 + $0xfc8] sm:$0xff] }
 0x213   : > { %v2761_v45 = vpop.eup %2760  ;;  %1625 = vst [vmem:[%s3101_s17 + $0xe78] sm:$0xff] %v2759_v43  ;;  %2780 = vtanh.f32 %v612_v40  ;;  %v644_v40 = vld [vmem:[%s3079_s30 + $0xfd0] sm:$0xff] }
 0x214   : > { %v2763_v47 = vpop.eup %2762  ;;  %1626 = vst [vmem:[%s3101_s17 + $0xe80] sm:$0xff] %v2761_v45  ;;  %2782 = vtanh.f32 %v613_v42  ;;  %v645_v42 = vld [vmem:[%s3079_s30 + $0xfd8] sm:$0xff] }
 0x215   : > { %v2765_v49 = vpop.eup %2764  ;;  %1627 = vst [vmem:[%s3101_s17 + $0xe88] sm:$0xff] %v2763_v47  ;;  %2784 = vtanh.f32 %v614_v44  ;;  %v646_v44 = vld [vmem:[%s3079_s30 + $0xfe0] sm:$0xff] }
 0x216   : > { %v2767_v51 = vpop.eup %2766  ;;  %1628 = vst [vmem:[%s3101_s17 + $0xe90] sm:$0xff] %v2765_v49  ;;  %2786 = vtanh.f32 %v615_v46  ;;  %v647_v46 = vld [vmem:[%s3079_s30 + $0xfe8] sm:$0xff] }
 0x217   : > { %v2769_v53 = vpop.eup %2768  ;;  %1629 = vst [vmem:[%s3101_s17 + $0xe98] sm:$0xff] %v2767_v51  ;;  %2788 = vtanh.f32 %v616_v48  ;;  %v648_v48 = vld [vmem:[%s3079_s30 + $0xff0] sm:$0xff] }
 0x218   : > { %v2771_v55 = vpop.eup %2770  ;;  %1630 = vst [vmem:[%s3101_s17 + $0xea0] sm:$0xff] %v2769_v53  ;;  %2790 = vtanh.f32 %v617_v50  ;;  %v649_v50 = vld [vmem:[%s3079_s30 + $0xff8] sm:$0xff] }
 0x219   : > { %v2773_v57 = vpop.eup %2772  ;;  %1631 = vst [vmem:[%s3101_s17 + $0xea8] sm:$0xff] %v2771_v55  ;;  %2792 = vtanh.f32 %v618_v52 }
 0x21a   : > { %v2775_v59 = vpop.eup %2774  ;;  %1632 = vst [vmem:[%s3101_s17 + $0xeb0] sm:$0xff] %v2773_v57  ;;  %2794 = vtanh.f32 %v619_v54 }
 0x21b   : > { %v2777_v61 = vpop.eup %2776  ;;  %1633 = vst [vmem:[%s3101_s17 + $0xeb8] sm:$0xff] %v2775_v59  ;;  %2796 = vtanh.f32 %v620_v56 }
 0x21c   : > { %v2779_v63 = vpop.eup %2778  ;;  %1634 = vst [vmem:[%s3101_s17 + $0xec0] sm:$0xff] %v2777_v61  ;;  %2798 = vtanh.f32 %v621_v58 }
 0x21d   : > { %v2781_v1 = vpop.eup %2780  ;;  %1635 = vst [vmem:[%s3101_s17 + $0xec8] sm:$0xff] %v2779_v63  ;;  %2800 = vtanh.f32 %v622_v60 }
 0x21e   : > { %v2783_v3 = vpop.eup %2782  ;;  %1636 = vst [vmem:[%s3101_s17 + $0xed0] sm:$0xff] %v2781_v1  ;;  %2802 = vtanh.f32 %v623_v62 }
 0x21f   : > { %v2785_v5 = vpop.eup %2784  ;;  %1637 = vst [vmem:[%s3101_s17 + $0xed8] sm:$0xff] %v2783_v3  ;;  %2804 = vtanh.f32 %v624_v0 }
 0x220   : > { %v2787_v7 = vpop.eup %2786  ;;  %1638 = vst [vmem:[%s3101_s17 + $0xee0] sm:$0xff] %v2785_v5  ;;  %2806 = vtanh.f32 %v625_v2 }
 0x221   : > { %v2789_v9 = vpop.eup %2788  ;;  %1639 = vst [vmem:[%s3101_s17 + $0xee8] sm:$0xff] %v2787_v7  ;;  %2808 = vtanh.f32 %v626_v4 }
 0x222   : > { %v2791_v11 = vpop.eup %2790  ;;  %1640 = vst [vmem:[%s3101_s17 + $0xef0] sm:$0xff] %v2789_v9  ;;  %2810 = vtanh.f32 %v627_v6 }
 0x223   : > { %v2793_v13 = vpop.eup %2792  ;;  %1641 = vst [vmem:[%s3101_s17 + $0xef8] sm:$0xff] %v2791_v11  ;;  %2812 = vtanh.f32 %v628_v8 }
 0x224   : > { %v2795_v15 = vpop.eup %2794  ;;  %1642 = vst [vmem:[%s3101_s17 + $0xf00] sm:$0xff] %v2793_v13  ;;  %2814 = vtanh.f32 %v629_v10 }
 0x225   : > { %v2797_v17 = vpop.eup %2796  ;;  %1643 = vst [vmem:[%s3101_s17 + $0xf08] sm:$0xff] %v2795_v15  ;;  %2816 = vtanh.f32 %v630_v12 }
 0x226   : > { %v2799_v19 = vpop.eup %2798  ;;  %1644 = vst [vmem:[%s3101_s17 + $0xf10] sm:$0xff] %v2797_v17  ;;  %2818 = vtanh.f32 %v631_v14 }
 0x227   : > { %v2801_v21 = vpop.eup %2800  ;;  %1645 = vst [vmem:[%s3101_s17 + $0xf18] sm:$0xff] %v2799_v19  ;;  %2820 = vtanh.f32 %v632_v16 }
 0x228   : > { %v2803_v23 = vpop.eup %2802  ;;  %1646 = vst [vmem:[%s3101_s17 + $0xf20] sm:$0xff] %v2801_v21  ;;  %2822 = vtanh.f32 %v633_v18 }
 0x229   : > { %v2805_v25 = vpop.eup %2804  ;;  %1647 = vst [vmem:[%s3101_s17 + $0xf28] sm:$0xff] %v2803_v23  ;;  %2824 = vtanh.f32 %v634_v20 }
 0x22a   : > { %v2807_v27 = vpop.eup %2806  ;;  %1648 = vst [vmem:[%s3101_s17 + $0xf30] sm:$0xff] %v2805_v25  ;;  %2826 = vtanh.f32 %v635_v22 }
 0x22b   : > { %v2809_v29 = vpop.eup %2808  ;;  %1649 = vst [vmem:[%s3101_s17 + $0xf38] sm:$0xff] %v2807_v27  ;;  %2828 = vtanh.f32 %v636_v24 }
 0x22c   : > { %v2811_v31 = vpop.eup %2810  ;;  %1650 = vst [vmem:[%s3101_s17 + $0xf40] sm:$0xff] %v2809_v29  ;;  %2830 = vtanh.f32 %v637_v26 }
 0x22d   : > { %v2813_v33 = vpop.eup %2812  ;;  %1651 = vst [vmem:[%s3101_s17 + $0xf48] sm:$0xff] %v2811_v31  ;;  %2832 = vtanh.f32 %v638_v28 }
 0x22e   : > { %v2815_v35 = vpop.eup %2814  ;;  %1652 = vst [vmem:[%s3101_s17 + $0xf50] sm:$0xff] %v2813_v33  ;;  %2834 = vtanh.f32 %v639_v30 }
 0x22f   : > { %v2817_v37 = vpop.eup %2816  ;;  %1653 = vst [vmem:[%s3101_s17 + $0xf58] sm:$0xff] %v2815_v35  ;;  %2836 = vtanh.f32 %v640_v32 }
 0x230   : > { %v2819_v39 = vpop.eup %2818  ;;  %1654 = vst [vmem:[%s3101_s17 + $0xf60] sm:$0xff] %v2817_v37  ;;  %2838 = vtanh.f32 %v641_v34 }
 0x231   : > { %v2821_v41 = vpop.eup %2820  ;;  %1655 = vst [vmem:[%s3101_s17 + $0xf68] sm:$0xff] %v2819_v39  ;;  %2840 = vtanh.f32 %v642_v36 }
 0x232   : > { %v2823_v43 = vpop.eup %2822  ;;  %1656 = vst [vmem:[%s3101_s17 + $0xf70] sm:$0xff] %v2821_v41  ;;  %2842 = vtanh.f32 %v643_v38 }
 0x233   : > { %v2825_v45 = vpop.eup %2824  ;;  %1657 = vst [vmem:[%s3101_s17 + $0xf78] sm:$0xff] %v2823_v43  ;;  %2844 = vtanh.f32 %v644_v40 }
 0x234   : > { %v2827_v47 = vpop.eup %2826  ;;  %1658 = vst [vmem:[%s3101_s17 + $0xf80] sm:$0xff] %v2825_v45  ;;  %2846 = vtanh.f32 %v645_v42 }
 0x235   : > { %v2829_v49 = vpop.eup %2828  ;;  %1659 = vst [vmem:[%s3101_s17 + $0xf88] sm:$0xff] %v2827_v47  ;;  %2848 = vtanh.f32 %v646_v44 }
 0x236   : > { %v2831_v51 = vpop.eup %2830  ;;  %1660 = vst [vmem:[%s3101_s17 + $0xf90] sm:$0xff] %v2829_v49  ;;  %2850 = vtanh.f32 %v647_v46 }
 0x237   : > { %v2833_v52 = vpop.eup %2832  ;;  %1661 = vst [vmem:[%s3101_s17 + $0xf98] sm:$0xff] %v2831_v51  ;;  %2852 = vtanh.f32 %v648_v48 }
 0x238   : > { %v2835_v53 = vpop.eup %2834  ;;  %1662 = vst [vmem:[%s3101_s17 + $0xfa0] sm:$0xff] %v2833_v52  ;;  %2854 = vtanh.f32 %v649_v50 }
 0x239   : > { %v2837_v54 = vpop.eup %2836  ;;  %1663 = vst [vmem:[%s3101_s17 + $0xfa8] sm:$0xff] %v2835_v53 }
 0x23a   : > { %v2839_v55 = vpop.eup %2838  ;;  %1664 = vst [vmem:[%s3101_s17 + $0xfb0] sm:$0xff] %v2837_v54 }
 0x23b   : > { %v2841_v56 = vpop.eup %2840  ;;  %1665 = vst [vmem:[%s3101_s17 + $0xfb8] sm:$0xff] %v2839_v55 }
 0x23c   : > { %v2843_v57 = vpop.eup %2842  ;;  %1666 = vst [vmem:[%s3101_s17 + $0xfc0] sm:$0xff] %v2841_v56 }
 0x23d   : > { %v2845_v58 = vpop.eup %2844  ;;  %1667 = vst [vmem:[%s3101_s17 + $0xfc8] sm:$0xff] %v2843_v57 }
 0x23e   : > { %v2847_v59 = vpop.eup %2846  ;;  %1668 = vst [vmem:[%s3101_s17 + $0xfd0] sm:$0xff] %v2845_v58 }
 0x23f   : > { %v2849_v60 = vpop.eup %2848  ;;  %1669 = vst [vmem:[%s3101_s17 + $0xfd8] sm:$0xff] %v2847_v59 }
 0x240   : > { %v2851_v61 = vpop.eup %2850  ;;  %1670 = vst [vmem:[%s3101_s17 + $0xfe0] sm:$0xff] %v2849_v60 }
 0x241   : > { %v2853_v62 = vpop.eup %2852  ;;  %1671 = vst [vmem:[%s3101_s17 + $0xfe8] sm:$0xff] %v2851_v61 }
 0x242   : > { %v2855_v63 = vpop.eup %2854  ;;  %1672 = vst [vmem:[%s3101_s17 + $0xff0] sm:$0xff] %v2853_v62 }
 0x243   : > { %1673 = vst [vmem:[%s3101_s17 + $0xff8] sm:$0xff] %v2855_v63 }
 0x244   : > { %2899 = shalt.err (!%p2896_p1)
}
 0x245   : > { %s2900_s13 = scalar_lea.hbm %s4115_s2, 65536  ;;  %s2904_s20 = scalar_lea.hbm %s4164_s1, 262144 }
 0x246   : > { %p2901_p3 = scmp.ne.s32.totalorder %s4115_s2, %s2900_s13  ;;  %p2905_p0 = scmp.lt.u32.totalorder %s4115_s2, %s4164_s1 }
 0x247   : > { %p2906_p2 = scmp.lt.u32.totalorder %s2904_s20, %s2900_s13  ;;  %p2908_p6 = scmp.lt.u32.totalorder %s2900_s13, %s4115_s2 }
 0x248   : > { %p2902_p4 = pnand %p2901_p3, %p4171_p10 }
 0x249   : > { %p2907_p7 = por %p2906_p2, %p2905_p0 }
 0x24a   : > { %p2903_p5 = pneg %p2902_p4 }
 0x24b   : > { %p2909_p11 = por %p2908_p6, %p2907_p7 }
 0x24d   : > { %p2910_p12 = pnand %p2909_p11, %p2903_p5 }
 0x24f   : > { %2913 = shalt.err (!%p2910_p12)
}
 0x250   : > { %s2958_s24 = smov 1024   ;;  %s2959_s26 = smov 64  }
 0x251   : > { %1784 = dma.vmem_to_hbm [thread:$0]  (%p4171_p10), %s4117_s27, 65536, %s4115_s2, %s1675_s10, %s2958_s24, %s2958_s24, %s2959_s26  }
 0x252 PF: > { %p1795_p8 = scmp.ge.s32.totalorder %s2952_s9, 2  ;;  %s1704_s30 = sand.u32 1, %s2940_s6  }
 0x253   : > { %p4172_p9 = scmp.ne.s32.totalorder %s4169_s19, 0  ;;  %s1705_s17 = scalar_lea.sflag [#allocation4], %s1704_s30 }
 0x255   : > { %p1791_p13 = pnand %p1795_p8, %p4172_p9 }
 0x257   : > { %2935 = dma.done.wait (!%p1791_p13), %s1705_s17, 65536  }
 0x258   : > { %2937 = vsyncadd (!%p1791_p13), %s1705_s17, 4294901760  ;;  %p14_p1 = scmp.ge.s32.totalorder %s2995_s12, 6   ;;  %s4173_s6 = smov %s2944_s7 }
 0x259   : > { %s4174_s7 = smov %s2948_s8  ;;  %s4175_s8 = smov %s3007_s15 }
 0x25a   : > { %s4176_s9 = smov %s2995_s12  ;;  %16 = sbr.rel (!%p14_p1) target bundleno = 5 (0x5), region = 69 }
 0x261   :  { %1710 = vsyncpa [#allocation3], 1 }
 0x262   :  { %1712 = vsyncpa [#allocation3 + $0x1], 1 }
 0x263   :  { %1713 = vsyncpa [#allocation4], 1 }
 0x264   :  { %1715 = vsyncpa [#allocation4 + $0x1], 1 }

</bundles_post_ra>
